<compile_context>
chip_gen: v6e
topology: v6e:2x2x1
jax: 0.10.0
libtpu: 0.0.40
codegen_flags: <defaults>
</compile_context>

<pallas_src>
import jax
import jax.numpy as jnp
from jax.experimental import pallas as pl
from jax.experimental.pallas import tpu as pltpu

LANE = 128


def _round_up(x, m):
    return ((x + m - 1) // m) * m


def mlp_kernel(x_ref,
               w1_ref, b1_ref,
               w2_ref, b2_ref,
               w3_ref, b3_ref,
               w4_ref, b4_ref,
               w5_ref, b5_ref,
               w6_ref, b6_ref,
               o_ref):
    """Fused 6-layer MLP forward for one batch tile (all weights resident in VMEM)."""

    def layer(h, w_ref, b_ref, relu):
        # bf16 (or f32) MXU matmul with f32 accumulation; bias add / ReLU in f32.
        acc = jnp.dot(h.astype(w_ref.dtype), w_ref[...],
                      preferred_element_type=jnp.float32)
        acc = acc + b_ref[...]
        if relu:
            acc = jnp.maximum(acc, 0.0)
        return acc

    h = x_ref[...]
    h = layer(h, w1_ref, b1_ref, True)
    h = layer(h, w2_ref, b2_ref, True)
    h = layer(h, w3_ref, b3_ref, True)
    h = layer(h, w4_ref, b4_ref, True)
    h = layer(h, w5_ref, b5_ref, True)
    # fc6, no activation. Output block is lane-padded to 128 cols -> unmasked store.
    o_ref[...] = layer(h, w6_ref, b6_ref, False).astype(o_ref.dtype)


def mlp_forward(x, params, *, batch_tile=None, matmul_dtype=jnp.bfloat16):
    """x: (B, input_size) float32. params: list of (W, b) with W shaped (in, out)."""
    orig_dtype = x.dtype
    B, in_size = x.shape
    out_size = params[-1][0].shape[1]

    in_pad = _round_up(in_size, LANE)
    out_pad = _round_up(out_size, LANE)

    # ---- pad ALL feature dims to 128 lanes; cast weights to matmul dtype. ----
    padded = []
    prev_pad = in_pad
    for (w, b) in params:
        fin, fout = w.shape
        fout_pad = _round_up(fout, LANE)
        w_p = jnp.pad(w, ((0, prev_pad - fin), (0, fout_pad - fout)))
        b_p = jnp.pad(b, ((0, fout_pad - fout),)).reshape(1, fout_pad)
        padded.append((w_p.astype(matmul_dtype), b_p.astype(jnp.float32)))
        prev_pad = fout_pad
    hidden_pad = max([w.shape[1] for (w, _) in padded[:-1]] + [in_pad])

    # ---- VMEM budget (generation-aware; 64 MiB/TC on v7x, 128 MiB on v5e/v6e). ----
    try:
        vmem_cap = int(pltpu.get_tpu_info().vmem_capacity_bytes)
    except Exception:
        vmem_cap = 64 * 1024 * 1024            # conservative default (v7x per-TC)
    vmem_budget = int(vmem_cap * 0.7)          # headroom for compiler scratch

    x_bytes = jnp.dtype(matmul_dtype).itemsize
    resident_bytes = sum(int(w.size) * w.dtype.itemsize + int(b.size) * 4
                         for (w, b) in padded)
    # TODO(synk): if resident_bytes alone exceeds vmem_budget (very large hidden
    # sizes, esp. on v7x's 64 MiB VMEM), stream weights per layer instead of
    # keeping all six resident.

    def working_set(bt):
        return (2 * bt * in_pad * x_bytes          # double-buffered input tile
                + 2 * bt * out_pad * 4             # double-buffered f32 output tile
                + 2 * bt * hidden_pad * 4          # ~2 live f32 intermediates
                + resident_bytes)

    # ---- batch tile: single step for tiny B; >=2 MXU-filling steps otherwise. ----
    if batch_tile is None:
        if B <= 512:
            batch_tile = _round_up(B, 16)
        else:
            # >=2 grid steps so v7x's two TensorCores both get work;
            # 256-1024 rows per step is enough to fill the MXU on all gens.
            batch_tile = min(1024, max(256, _round_up(pl.cdiv(B, 2), 256)))
    batch_tile = max(16, _round_up(batch_tile, 16))
    while batch_tile > 16 and working_set(batch_tile) > vmem_budget:
        batch_tile = max(16, _round_up(batch_tile // 2, 16))

    # ---- pad batch so every grid step is a full, unmasked tile; pad/cast x. ----
    B_pad = _round_up(B, batch_tile)
    if B_pad != B:
        x = jnp.pad(x, ((0, B_pad - B), (0, 0)))
    if in_pad != in_size:
        x = jnp.pad(x, ((0, 0), (0, in_pad - in_size)))
    x = x.astype(matmul_dtype)

    flat_params = []
    for (w, b) in padded:
        flat_params.extend([w, b])

    def build_specs(single_buffer):
        specs = [pl.BlockSpec((batch_tile, in_pad), lambda i: (i, 0))]
        for arr in flat_params:
            if single_buffer:
                # Grid-invariant -> no re-DMA; single buffer halves VMEM footprint.
                specs.append(pl.BlockSpec(arr.shape, lambda i: (0, 0),
                                          pipeline_mode=pl.Buffered(1)))
            else:
                specs.append(pl.BlockSpec(arr.shape, lambda i: (0, 0)))
        return specs

    out_spec = pl.BlockSpec((batch_tile, out_pad), lambda i: (i, 0))

    # ---- advisory cost estimate for XLA's scheduler. ----
    flops = sum(2 * B_pad * int(w.shape[0]) * int(w.shape[1]) for (w, _) in padded)
    bytes_accessed = int(x.size) * x_bytes + B_pad * out_pad * 4 + resident_bytes
    cost = pl.CostEstimate(flops=flops, transcendentals=0,
                           bytes_accessed=bytes_accessed)

    def run(single_buffer):
        return pl.pallas_call(
            mlp_kernel,
            out_shape=jax.ShapeDtypeStruct((B_pad, out_pad), orig_dtype),
            grid=(B_pad // batch_tile,),
            in_specs=build_specs(single_buffer),
            out_specs=out_spec,
            compiler_params=pltpu.CompilerParams(
                dimension_semantics=("parallel",),
                vmem_limit_bytes=vmem_budget),
            cost_estimate=cost,
        )(x, *flat_params)

    try:
        out_padded = run(single_buffer=True)
    except Exception:
        # Fallback for jax versions without pipeline_mode=pl.Buffered on TPU.
        out_padded = run(single_buffer=False)

    # Strip batch / lane padding (tiny copy).
    return out_padded[:B, :out_size]


def init_params(key, input_size, hidden_size, output_size):
    """Deterministic init mirroring nn.Linear default (uniform +/- 1/sqrt(fan_in))."""
    sizes = [(input_size, hidden_size),
             (hidden_size, hidden_size),
             (hidden_size, hidden_size),
             (hidden_size, hidden_size),
             (hidden_size, hidden_size),
             (hidden_size, output_size)]
    params = []
    for (fan_in, fan_out) in sizes:
        key, kw, kb = jax.random.split(key, 3)
        bound = 1.0 / jnp.sqrt(fan_in)
        w = jax.random.uniform(kw, (fan_in, fan_out), jnp.float32, -bound, bound)
        b = jax.random.uniform(kb, (fan_out,), jnp.float32, -bound, bound)
        params.append((w, b))
    return params


def mlp_reference(x, params):
    h = x
    for i, (w, b) in enumerate(params):
        h = h @ w + b
        if i < len(params) - 1:
            h = jnp.maximum(h, 0.0)
    return h


if __name__ == "__main__":
    input_size = 8      # stands in for X_train.shape[1]
    hidden_size = 20
    output_size = 1
    batch = 16

    key = jax.random.PRNGKey(0)
    key, kx = jax.random.split(key)
    x = jax.random.normal(kx, (batch, input_size), jnp.float32)
    params = init_params(key, input_size, hidden_size, output_size)
    ref = mlp_reference(x, params)

    # Exact-semantics check: f32 matmul path vs reference (tight tolerance).
    out_f32 = jax.block_until_ready(mlp_forward(x, params, matmul_dtype=jnp.float32))
    assert out_f32.shape == (batch, output_size)
    assert jnp.allclose(out_f32, ref, atol=1e-5, rtol=1e-5), "mismatch (f32 path)"

    # Default bf16-MXU path (f32 accumulation) — looser tolerance.
    out = jax.block_until_ready(mlp_forward(x, params))
    assert out.shape == (batch, output_size)
    assert jnp.allclose(out, ref, atol=5e-2, rtol=5e-2), "mismatch (bf16 path, B=16)"

    # Multi-step grid + batch/lane padding path (B not a multiple of the tile).
    x2 = jax.random.normal(jax.random.PRNGKey(1), (40, input_size), jnp.float32)
    out2 = jax.block_until_ready(mlp_forward(x2, params, batch_tile=16))
    ref2 = mlp_reference(x2, params)
    assert out2.shape == (40, output_size)
    assert jnp.allclose(out2, ref2, atol=5e-2, rtol=5e-2), "mismatch (bf16 path, B=40)"

    print("KERNEL_OK")
</pallas_src>

<mosaic_0001>
module attributes {stable_mosaic.version = 11 : i64} {
  func.func @mlp_kernel(%arg0: i32, %arg1: memref<16x128xf32, #tpu.memory_space<vmem>>, %arg2: memref<128x128xf32, #tpu.memory_space<vmem>>, %arg3: memref<1x128xf32, #tpu.memory_space<vmem>>, %arg4: memref<128x128xf32, #tpu.memory_space<vmem>>, %arg5: memref<1x128xf32, #tpu.memory_space<vmem>>, %arg6: memref<128x128xf32, #tpu.memory_space<vmem>>, %arg7: memref<1x128xf32, #tpu.memory_space<vmem>>, %arg8: memref<128x128xf32, #tpu.memory_space<vmem>>, %arg9: memref<1x128xf32, #tpu.memory_space<vmem>>, %arg10: memref<128x128xf32, #tpu.memory_space<vmem>>, %arg11: memref<1x128xf32, #tpu.memory_space<vmem>>, %arg12: memref<128x128xf32, #tpu.memory_space<vmem>>, %arg13: memref<1x128xf32, #tpu.memory_space<vmem>>, %arg14: memref<16x128xf32, #tpu.memory_space<vmem>>) attributes {dimension_semantics = [#tpu.dimension_semantics<parallel>], iteration_bounds = array<i64: 1>, scalar_prefetch = 0 : i64, scratch_operands = 0 : i64, tpu.core_type = #tpu.core_type<tc>, window_params = [{transform_indices = @transform_0, window_bounds = array<i64: 16, 128>}, {pipeline_mode = #tpu.pipeline_mode<synchronous>, transform_indices = @transform_1, window_bounds = array<i64: 128, 128>}, {pipeline_mode = #tpu.pipeline_mode<synchronous>, transform_indices = @transform_2, window_bounds = array<i64: 1, 128>}, {pipeline_mode = #tpu.pipeline_mode<synchronous>, transform_indices = @transform_3, window_bounds = array<i64: 128, 128>}, {pipeline_mode = #tpu.pipeline_mode<synchronous>, transform_indices = @transform_4, window_bounds = array<i64: 1, 128>}, {pipeline_mode = #tpu.pipeline_mode<synchronous>, transform_indices = @transform_5, window_bounds = array<i64: 128, 128>}, {pipeline_mode = #tpu.pipeline_mode<synchronous>, transform_indices = @transform_6, window_bounds = array<i64: 1, 128>}, {pipeline_mode = #tpu.pipeline_mode<synchronous>, transform_indices = @transform_7, window_bounds = array<i64: 128, 128>}, {pipeline_mode = #tpu.pipeline_mode<synchronous>, transform_indices = @transform_8, window_bounds = array<i64: 1, 128>}, {pipeline_mode = #tpu.pipeline_mode<synchronous>, transform_indices = @transform_9, window_bounds = array<i64: 128, 128>}, {pipeline_mode = #tpu.pipeline_mode<synchronous>, transform_indices = @transform_10, window_bounds = array<i64: 1, 128>}, {pipeline_mode = #tpu.pipeline_mode<synchronous>, transform_indices = @transform_11, window_bounds = array<i64: 128, 128>}, {pipeline_mode = #tpu.pipeline_mode<synchronous>, transform_indices = @transform_12, window_bounds = array<i64: 1, 128>}, {transform_indices = @transform_13, window_bounds = array<i64: 16, 128>}]} {
    %c0 = arith.constant 0 : index
    %c0_0 = arith.constant 0 : index
    %0 = vector.load %arg1[%c0, %c0_0] : memref<16x128xf32, #tpu.memory_space<vmem>>, vector<16x128xf32>
    %c0_1 = arith.constant 0 : index
    %c0_2 = arith.constant 0 : index
    %1 = vector.load %arg2[%c0_1, %c0_2] : memref<128x128xf32, #tpu.memory_space<vmem>>, vector<128x128xf32>
    %cst = arith.constant dense<0.000000e+00> : vector<16x128xf32>
    %2 = tpu.matmul %0, %1, %cst {dimension_numbers = #tpu.dot_dimension_numbers<[1], [0], [0], [1], [0, 0, 1, 1], [], []>} : vector<16x128xf32>, vector<128x128xf32>, vector<16x128xf32> -> vector<16x128xf32>
    %c0_3 = arith.constant 0 : index
    %c0_4 = arith.constant 0 : index
    %3 = vector.load %arg3[%c0_3, %c0_4] : memref<1x128xf32, #tpu.memory_space<vmem>>, vector<1x128xf32>
    %4 = vector.broadcast %3 : vector<1x128xf32> to vector<16x128xf32>
    %5 = arith.addf %2, %4 : vector<16x128xf32>
    %cst_5 = arith.constant 0.000000e+00 : f32
    %6 = vector.broadcast %cst_5 : f32 to vector<16x128xf32>
    %7 = arith.maximumf %5, %6 : vector<16x128xf32>
    %c0_6 = arith.constant 0 : index
    %c0_7 = arith.constant 0 : index
    %8 = vector.load %arg4[%c0_6, %c0_7] : memref<128x128xf32, #tpu.memory_space<vmem>>, vector<128x128xf32>
    %cst_8 = arith.constant dense<0.000000e+00> : vector<16x128xf32>
    %9 = tpu.matmul %7, %8, %cst_8 {dimension_numbers = #tpu.dot_dimension_numbers<[1], [0], [0], [1], [0, 0, 1, 1], [], []>} : vector<16x128xf32>, vector<128x128xf32>, vector<16x128xf32> -> vector<16x128xf32>
    %c0_9 = arith.constant 0 : index
    %c0_10 = arith.constant 0 : index
    %10 = vector.load %arg5[%c0_9, %c0_10] : memref<1x128xf32, #tpu.memory_space<vmem>>, vector<1x128xf32>
    %11 = vector.broadcast %10 : vector<1x128xf32> to vector<16x128xf32>
    %12 = arith.addf %9, %11 : vector<16x128xf32>
    %cst_11 = arith.constant 0.000000e+00 : f32
    %13 = vector.broadcast %cst_11 : f32 to vector<16x128xf32>
    %14 = arith.maximumf %12, %13 : vector<16x128xf32>
    %c0_12 = arith.constant 0 : index
    %c0_13 = arith.constant 0 : index
    %15 = vector.load %arg6[%c0_12, %c0_13] : memref<128x128xf32, #tpu.memory_space<vmem>>, vector<128x128xf32>
    %cst_14 = arith.constant dense<0.000000e+00> : vector<16x128xf32>
    %16 = tpu.matmul %14, %15, %cst_14 {dimension_numbers = #tpu.dot_dimension_numbers<[1], [0], [0], [1], [0, 0, 1, 1], [], []>} : vector<16x128xf32>, vector<128x128xf32>, vector<16x128xf32> -> vector<16x128xf32>
    %c0_15 = arith.constant 0 : index
    %c0_16 = arith.constant 0 : index
    %17 = vector.load %arg7[%c0_15, %c0_16] : memref<1x128xf32, #tpu.memory_space<vmem>>, vector<1x128xf32>
    %18 = vector.broadcast %17 : vector<1x128xf32> to vector<16x128xf32>
    %19 = arith.addf %16, %18 : vector<16x128xf32>
    %cst_17 = arith.constant 0.000000e+00 : f32
    %20 = vector.broadcast %cst_17 : f32 to vector<16x128xf32>
    %21 = arith.maximumf %19, %20 : vector<16x128xf32>
    %c0_18 = arith.constant 0 : index
    %c0_19 = arith.constant 0 : index
    %22 = vector.load %arg8[%c0_18, %c0_19] : memref<128x128xf32, #tpu.memory_space<vmem>>, vector<128x128xf32>
    %cst_20 = arith.constant dense<0.000000e+00> : vector<16x128xf32>
    %23 = tpu.matmul %21, %22, %cst_20 {dimension_numbers = #tpu.dot_dimension_numbers<[1], [0], [0], [1], [0, 0, 1, 1], [], []>} : vector<16x128xf32>, vector<128x128xf32>, vector<16x128xf32> -> vector<16x128xf32>
    %c0_21 = arith.constant 0 : index
    %c0_22 = arith.constant 0 : index
    %24 = vector.load %arg9[%c0_21, %c0_22] : memref<1x128xf32, #tpu.memory_space<vmem>>, vector<1x128xf32>
    %25 = vector.broadcast %24 : vector<1x128xf32> to vector<16x128xf32>
    %26 = arith.addf %23, %25 : vector<16x128xf32>
    %cst_23 = arith.constant 0.000000e+00 : f32
    %27 = vector.broadcast %cst_23 : f32 to vector<16x128xf32>
    %28 = arith.maximumf %26, %27 : vector<16x128xf32>
    %c0_24 = arith.constant 0 : index
    %c0_25 = arith.constant 0 : index
    %29 = vector.load %arg10[%c0_24, %c0_25] : memref<128x128xf32, #tpu.memory_space<vmem>>, vector<128x128xf32>
    %cst_26 = arith.constant dense<0.000000e+00> : vector<16x128xf32>
    %30 = tpu.matmul %28, %29, %cst_26 {dimension_numbers = #tpu.dot_dimension_numbers<[1], [0], [0], [1], [0, 0, 1, 1], [], []>} : vector<16x128xf32>, vector<128x128xf32>, vector<16x128xf32> -> vector<16x128xf32>
    %c0_27 = arith.constant 0 : index
    %c0_28 = arith.constant 0 : index
    %31 = vector.load %arg11[%c0_27, %c0_28] : memref<1x128xf32, #tpu.memory_space<vmem>>, vector<1x128xf32>
    %32 = vector.broadcast %31 : vector<1x128xf32> to vector<16x128xf32>
    %33 = arith.addf %30, %32 : vector<16x128xf32>
    %cst_29 = arith.constant 0.000000e+00 : f32
    %34 = vector.broadcast %cst_29 : f32 to vector<16x128xf32>
    %35 = arith.maximumf %33, %34 : vector<16x128xf32>
    %c0_30 = arith.constant 0 : index
    %c0_31 = arith.constant 0 : index
    %36 = vector.load %arg12[%c0_30, %c0_31] : memref<128x128xf32, #tpu.memory_space<vmem>>, vector<128x128xf32>
    %cst_32 = arith.constant dense<0.000000e+00> : vector<16x128xf32>
    %37 = tpu.matmul %35, %36, %cst_32 {dimension_numbers = #tpu.dot_dimension_numbers<[1], [0], [0], [1], [0, 0, 1, 1], [], []>} : vector<16x128xf32>, vector<128x128xf32>, vector<16x128xf32> -> vector<16x128xf32>
    %c0_33 = arith.constant 0 : index
    %c0_34 = arith.constant 0 : index
    %38 = vector.load %arg13[%c0_33, %c0_34] : memref<1x128xf32, #tpu.memory_space<vmem>>, vector<1x128xf32>
    %39 = vector.broadcast %38 : vector<1x128xf32> to vector<16x128xf32>
    %40 = arith.addf %37, %39 : vector<16x128xf32>
    %c0_35 = arith.constant 0 : index
    %c0_36 = arith.constant 0 : index
    %41 = vector.load %arg14[%c0_35, %c0_36] : memref<16x128xf32, #tpu.memory_space<vmem>>, vector<16x128xf32>
    tpu.vector_store %arg14[%c0_35, %c0_36], %40 {strides = array<i32>} : memref<16x128xf32, #tpu.memory_space<vmem>>, vector<16x128xf32>,
    return
  }
  func.func @transform_0(%arg0: i32) -> (i32, i32) {
    %c0_i32 = arith.constant 0 : i32
    %c0_i32_0 = arith.constant 0 : i32
    return %arg0, %c0_i32 : i32, i32
  }
  func.func @transform_1(%arg0: i32) -> (i32, i32) {
    %c0_i32 = arith.constant 0 : i32
    %c0_i32_0 = arith.constant 0 : i32
    %c0_i32_1 = arith.constant 0 : i32
    return %c0_i32, %c0_i32_0 : i32, i32
  }
  func.func @transform_2(%arg0: i32) -> (i32, i32) {
    %c0_i32 = arith.constant 0 : i32
    %c0_i32_0 = arith.constant 0 : i32
    %c0_i32_1 = arith.constant 0 : i32
    return %c0_i32, %c0_i32_0 : i32, i32
  }
  func.func @transform_3(%arg0: i32) -> (i32, i32) {
    %c0_i32 = arith.constant 0 : i32
    %c0_i32_0 = arith.constant 0 : i32
    %c0_i32_1 = arith.constant 0 : i32
    return %c0_i32, %c0_i32_0 : i32, i32
  }
  func.func @transform_4(%arg0: i32) -> (i32, i32) {
    %c0_i32 = arith.constant 0 : i32
    %c0_i32_0 = arith.constant 0 : i32
    %c0_i32_1 = arith.constant 0 : i32
    return %c0_i32, %c0_i32_0 : i32, i32
  }
  func.func @transform_5(%arg0: i32) -> (i32, i32) {
    %c0_i32 = arith.constant 0 : i32
    %c0_i32_0 = arith.constant 0 : i32
    %c0_i32_1 = arith.constant 0 : i32
    return %c0_i32, %c0_i32_0 : i32, i32
  }
  func.func @transform_6(%arg0: i32) -> (i32, i32) {
    %c0_i32 = arith.constant 0 : i32
    %c0_i32_0 = arith.constant 0 : i32
    %c0_i32_1 = arith.constant 0 : i32
    return %c0_i32, %c0_i32_0 : i32, i32
  }
  func.func @transform_7(%arg0: i32) -> (i32, i32) {
    %c0_i32 = arith.constant 0 : i32
    %c0_i32_0 = arith.constant 0 : i32
    %c0_i32_1 = arith.constant 0 : i32
    return %c0_i32, %c0_i32_0 : i32, i32
  }
  func.func @transform_8(%arg0: i32) -> (i32, i32) {
    %c0_i32 = arith.constant 0 : i32
    %c0_i32_0 = arith.constant 0 : i32
    %c0_i32_1 = arith.constant 0 : i32
    return %c0_i32, %c0_i32_0 : i32, i32
  }
  func.func @transform_9(%arg0: i32) -> (i32, i32) {
    %c0_i32 = arith.constant 0 : i32
    %c0_i32_0 = arith.constant 0 : i32
    %c0_i32_1 = arith.constant 0 : i32
    return %c0_i32, %c0_i32_0 : i32, i32
  }
  func.func @transform_10(%arg0: i32) -> (i32, i32) {
    %c0_i32 = arith.constant 0 : i32
    %c0_i32_0 = arith.constant 0 : i32
    %c0_i32_1 = arith.constant 0 : i32
    return %c0_i32, %c0_i32_0 : i32, i32
  }
  func.func @transform_11(%arg0: i32) -> (i32, i32) {
    %c0_i32 = arith.constant 0 : i32
    %c0_i32_0 = arith.constant 0 : i32
    %c0_i32_1 = arith.constant 0 : i32
    return %c0_i32, %c0_i32_0 : i32, i32
  }
  func.func @transform_12(%arg0: i32) -> (i32, i32) {
    %c0_i32 = arith.constant 0 : i32
    %c0_i32_0 = arith.constant 0 : i32
    %c0_i32_1 = arith.constant 0 : i32
    return %c0_i32, %c0_i32_0 : i32, i32
  }
  func.func @transform_13(%arg0: i32) -> (i32, i32) {
    %c0_i32 = arith.constant 0 : i32
    %c0_i32_0 = arith.constant 0 : i32
    return %arg0, %c0_i32 : i32, i32
  }
}

module attributes {stable_mosaic.version = 11 : i64} {
  func.func @mlp_kernel(%arg0: i32, %arg1: memref<16x128xf32, #tpu.memory_space<vmem>>, %arg2: memref<128x128xf32, #tpu.memory_space<vmem>>, %arg3: memref<1x128xf32, #tpu.memory_space<vmem>>, %arg4: memref<128x128xf32, #tpu.memory_space<vmem>>, %arg5: memref<1x128xf32, #tpu.memory_space<vmem>>, %arg6: memref<128x128xf32, #tpu.memory_space<vmem>>, %arg7: memref<1x128xf32, #tpu.memory_space<vmem>>, %arg8: memref<128x128xf32, #tpu.memory_space<vmem>>, %arg9: memref<1x128xf32, #tpu.memory_space<vmem>>, %arg10: memref<128x128xf32, #tpu.memory_space<vmem>>, %arg11: memref<1x128xf32, #tpu.memory_space<vmem>>, %arg12: memref<128x128xf32, #tpu.memory_space<vmem>>, %arg13: memref<1x128xf32, #tpu.memory_space<vmem>>, %arg14: memref<16x128xf32, #tpu.memory_space<vmem>>) attributes {dimension_semantics = [#tpu.dimension_semantics<parallel>], iteration_bounds = array<i64: 1>, scalar_prefetch = 0 : i64, scratch_operands = 0 : i64, tpu.core_type = #tpu.core_type<tc>, window_params = [{transform_indices = @transform_0, window_bounds = array<i64: 16, 128>}, {pipeline_mode = #tpu.pipeline_mode<synchronous>, transform_indices = @transform_1, window_bounds = array<i64: 128, 128>}, {pipeline_mode = #tpu.pipeline_mode<synchronous>, transform_indices = @transform_2, window_bounds = array<i64: 1, 128>}, {pipeline_mode = #tpu.pipeline_mode<synchronous>, transform_indices = @transform_3, window_bounds = array<i64: 128, 128>}, {pipeline_mode = #tpu.pipeline_mode<synchronous>, transform_indices = @transform_4, window_bounds = array<i64: 1, 128>}, {pipeline_mode = #tpu.pipeline_mode<synchronous>, transform_indices = @transform_5, window_bounds = array<i64: 128, 128>}, {pipeline_mode = #tpu.pipeline_mode<synchronous>, transform_indices = @transform_6, window_bounds = array<i64: 1, 128>}, {pipeline_mode = #tpu.pipeline_mode<synchronous>, transform_indices = @transform_7, window_bounds = array<i64: 128, 128>}, {pipeline_mode = #tpu.pipeline_mode<synchronous>, transform_indices = @transform_8, window_bounds = array<i64: 1, 128>}, {pipeline_mode = #tpu.pipeline_mode<synchronous>, transform_indices = @transform_9, window_bounds = array<i64: 128, 128>}, {pipeline_mode = #tpu.pipeline_mode<synchronous>, transform_indices = @transform_10, window_bounds = array<i64: 1, 128>}, {pipeline_mode = #tpu.pipeline_mode<synchronous>, transform_indices = @transform_11, window_bounds = array<i64: 128, 128>}, {pipeline_mode = #tpu.pipeline_mode<synchronous>, transform_indices = @transform_12, window_bounds = array<i64: 1, 128>}, {transform_indices = @transform_13, window_bounds = array<i64: 16, 128>}]} {
    %c0 = arith.constant 0 : index
    %c0_0 = arith.constant 0 : index
    %0 = vector.load %arg1[%c0, %c0_0] : memref<16x128xf32, #tpu.memory_space<vmem>>, vector<16x128xf32>
    %c0_1 = arith.constant 0 : index
    %c0_2 = arith.constant 0 : index
    %1 = vector.load %arg2[%c0_1, %c0_2] : memref<128x128xf32, #tpu.memory_space<vmem>>, vector<128x128xf32>
    %cst = arith.constant dense<0.000000e+00> : vector<16x128xf32>
    %2 = tpu.matmul %0, %1, %cst {dimension_numbers = #tpu.dot_dimension_numbers<[1], [0], [0], [1], [0, 0, 1, 1], [], []>} : vector<16x128xf32>, vector<128x128xf32>, vector<16x128xf32> -> vector<16x128xf32>
    %c0_3 = arith.constant 0 : index
    %c0_4 = arith.constant 0 : index
    %3 = vector.load %arg3[%c0_3, %c0_4] : memref<1x128xf32, #tpu.memory_space<vmem>>, vector<1x128xf32>
    %4 = vector.broadcast %3 : vector<1x128xf32> to vector<16x128xf32>
    %5 = arith.addf %2, %4 : vector<16x128xf32>
    %cst_5 = arith.constant 0.000000e+00 : f32
    %6 = vector.broadcast %cst_5 : f32 to vector<16x128xf32>
    %7 = arith.maximumf %5, %6 : vector<16x128xf32>
    %c0_6 = arith.constant 0 : index
    %c0_7 = arith.constant 0 : index
    %8 = vector.load %arg4[%c0_6, %c0_7] : memref<128x128xf32, #tpu.memory_space<vmem>>, vector<128x128xf32>
    %cst_8 = arith.constant dense<0.000000e+00> : vector<16x128xf32>
    %9 = tpu.matmul %7, %8, %cst_8 {dimension_numbers = #tpu.dot_dimension_numbers<[1], [0], [0], [1], [0, 0, 1, 1], [], []>} : vector<16x128xf32>, vector<128x128xf32>, vector<16x128xf32> -> vector<16x128xf32>
    %c0_9 = arith.constant 0 : index
    %c0_10 = arith.constant 0 : index
    %10 = vector.load %arg5[%c0_9, %c0_10] : memref<1x128xf32, #tpu.memory_space<vmem>>, vector<1x128xf32>
    %11 = vector.broadcast %10 : vector<1x128xf32> to vector<16x128xf32>
    %12 = arith.addf %9, %11 : vector<16x128xf32>
    %cst_11 = arith.constant 0.000000e+00 : f32
    %13 = vector.broadcast %cst_11 : f32 to vector<16x128xf32>
    %14 = arith.maximumf %12, %13 : vector<16x128xf32>
    %c0_12 = arith.constant 0 : index
    %c0_13 = arith.constant 0 : index
    %15 = vector.load %arg6[%c0_12, %c0_13] : memref<128x128xf32, #tpu.memory_space<vmem>>, vector<128x128xf32>
    %cst_14 = arith.constant dense<0.000000e+00> : vector<16x128xf32>
    %16 = tpu.matmul %14, %15, %cst_14 {dimension_numbers = #tpu.dot_dimension_numbers<[1], [0], [0], [1], [0, 0, 1, 1], [], []>} : vector<16x128xf32>, vector<128x128xf32>, vector<16x128xf32> -> vector<16x128xf32>
    %c0_15 = arith.constant 0 : index
    %c0_16 = arith.constant 0 : index
    %17 = vector.load %arg7[%c0_15, %c0_16] : memref<1x128xf32, #tpu.memory_space<vmem>>, vector<1x128xf32>
    %18 = vector.broadcast %17 : vector<1x128xf32> to vector<16x128xf32>
    %19 = arith.addf %16, %18 : vector<16x128xf32>
    %cst_17 = arith.constant 0.000000e+00 : f32
    %20 = vector.broadcast %cst_17 : f32 to vector<16x128xf32>
    %21 = arith.maximumf %19, %20 : vector<16x128xf32>
    %c0_18 = arith.constant 0 : index
    %c0_19 = arith.constant 0 : index
    %22 = vector.load %arg8[%c0_18, %c0_19] : memref<128x128xf32, #tpu.memory_space<vmem>>, vector<128x128xf32>
    %cst_20 = arith.constant dense<0.000000e+00> : vector<16x128xf32>
    %23 = tpu.matmul %21, %22, %cst_20 {dimension_numbers = #tpu.dot_dimension_numbers<[1], [0], [0], [1], [0, 0, 1, 1], [], []>} : vector<16x128xf32>, vector<128x128xf32>, vector<16x128xf32> -> vector<16x128xf32>
    %c0_21 = arith.constant 0 : index
    %c0_22 = arith.constant 0 : index
    %24 = vector.load %arg9[%c0_21, %c0_22] : memref<1x128xf32, #tpu.memory_space<vmem>>, vector<1x128xf32>
    %25 = vector.broadcast %24 : vector<1x128xf32> to vector<16x128xf32>
    %26 = arith.addf %23, %25 : vector<16x128xf32>
    %cst_23 = arith.constant 0.000000e+00 : f32
    %27 = vector.broadcast %cst_23 : f32 to vector<16x128xf32>
    %28 = arith.maximumf %26, %27 : vector<16x128xf32>
    %c0_24 = arith.constant 0 : index
    %c0_25 = arith.constant 0 : index
    %29 = vector.load %arg10[%c0_24, %c0_25] : memref<128x128xf32, #tpu.memory_space<vmem>>, vector<128x128xf32>
    %cst_26 = arith.constant dense<0.000000e+00> : vector<16x128xf32>
    %30 = tpu.matmul %28, %29, %cst_26 {dimension_numbers = #tpu.dot_dimension_numbers<[1], [0], [0], [1], [0, 0, 1, 1], [], []>} : vector<16x128xf32>, vector<128x128xf32>, vector<16x128xf32> -> vector<16x128xf32>
    %c0_27 = arith.constant 0 : index
    %c0_28 = arith.constant 0 : index
    %31 = vector.load %arg11[%c0_27, %c0_28] : memref<1x128xf32, #tpu.memory_space<vmem>>, vector<1x128xf32>
    %32 = vector.broadcast %31 : vector<1x128xf32> to vector<16x128xf32>
    %33 = arith.addf %30, %32 : vector<16x128xf32>
    %cst_29 = arith.constant 0.000000e+00 : f32
    %34 = vector.broadcast %cst_29 : f32 to vector<16x128xf32>
    %35 = arith.maximumf %33, %34 : vector<16x128xf32>
    %c0_30 = arith.constant 0 : index
    %c0_31 = arith.constant 0 : index
    %36 = vector.load %arg12[%c0_30, %c0_31] : memref<128x128xf32, #tpu.memory_space<vmem>>, vector<128x128xf32>
    %cst_32 = arith.constant dense<0.000000e+00> : vector<16x128xf32>
    %37 = tpu.matmul %35, %36, %cst_32 {dimension_numbers = #tpu.dot_dimension_numbers<[1], [0], [0], [1], [0, 0, 1, 1], [], []>} : vector<16x128xf32>, vector<128x128xf32>, vector<16x128xf32> -> vector<16x128xf32>
    %c0_33 = arith.constant 0 : index
    %c0_34 = arith.constant 0 : index
    %38 = vector.load %arg13[%c0_33, %c0_34] : memref<1x128xf32, #tpu.memory_space<vmem>>, vector<1x128xf32>
    %39 = vector.broadcast %38 : vector<1x128xf32> to vector<16x128xf32>
    %40 = arith.addf %37, %39 : vector<16x128xf32>
    %c0_35 = arith.constant 0 : index
    %c0_36 = arith.constant 0 : index
    %41 = vector.load %arg14[%c0_35, %c0_36] : memref<16x128xf32, #tpu.memory_space<vmem>>, vector<16x128xf32>
    tpu.vector_store %arg14[%c0_35, %c0_36], %40 {strides = array<i32>} : memref<16x128xf32, #tpu.memory_space<vmem>>, vector<16x128xf32>,
    return
  }
  func.func @transform_0(%arg0: i32) -> (i32, i32) {
    %c0_i32 = arith.constant 0 : i32
    %c0_i32_0 = arith.constant 0 : i32
    return %arg0, %c0_i32 : i32, i32
  }
  func.func @transform_1(%arg0: i32) -> (i32, i32) {
    %c0_i32 = arith.constant 0 : i32
    %c0_i32_0 = arith.constant 0 : i32
    %c0_i32_1 = arith.constant 0 : i32
    return %c0_i32, %c0_i32_0 : i32, i32
  }
  func.func @transform_2(%arg0: i32) -> (i32, i32) {
    %c0_i32 = arith.constant 0 : i32
    %c0_i32_0 = arith.constant 0 : i32
    %c0_i32_1 = arith.constant 0 : i32
    return %c0_i32, %c0_i32_0 : i32, i32
  }
  func.func @transform_3(%arg0: i32) -> (i32, i32) {
    %c0_i32 = arith.constant 0 : i32
    %c0_i32_0 = arith.constant 0 : i32
    %c0_i32_1 = arith.constant 0 : i32
    return %c0_i32, %c0_i32_0 : i32, i32
  }
  func.func @transform_4(%arg0: i32) -> (i32, i32) {
    %c0_i32 = arith.constant 0 : i32
    %c0_i32_0 = arith.constant 0 : i32
    %c0_i32_1 = arith.constant 0 : i32
    return %c0_i32, %c0_i32_0 : i32, i32
  }
  func.func @transform_5(%arg0: i32) -> (i32, i32) {
    %c0_i32 = arith.constant 0 : i32
    %c0_i32_0 = arith.constant 0 : i32
    %c0_i32_1 = arith.constant 0 : i32
    return %c0_i32, %c0_i32_0 : i32, i32
  }
  func.func @transform_6(%arg0: i32) -> (i32, i32) {
    %c0_i32 = arith.constant 0 : i32
    %c0_i32_0 = arith.constant 0 : i32
    %c0_i32_1 = arith.constant 0 : i32
    return %c0_i32, %c0_i32_0 : i32, i32
  }
  func.func @transform_7(%arg0: i32) -> (i32, i32) {
    %c0_i32 = arith.constant 0 : i32
    %c0_i32_0 = arith.constant 0 : i32
    %c0_i32_1 = arith.constant 0 : i32
    return %c0_i32, %c0_i32_0 : i32, i32
  }
  func.func @transform_8(%arg0: i32) -> (i32, i32) {
    %c0_i32 = arith.constant 0 : i32
    %c0_i32_0 = arith.constant 0 : i32
    %c0_i32_1 = arith.constant 0 : i32
    return %c0_i32, %c0_i32_0 : i32, i32
  }
  func.func @transform_9(%arg0: i32) -> (i32, i32) {
    %c0_i32 = arith.constant 0 : i32
    %c0_i32_0 = arith.constant 0 : i32
    %c0_i32_1 = arith.constant 0 : i32
    return %c0_i32, %c0_i32_0 : i32, i32
  }
  func.func @transform_10(%arg0: i32) -> (i32, i32) {
    %c0_i32 = arith.constant 0 : i32
    %c0_i32_0 = arith.constant 0 : i32
    %c0_i32_1 = arith.constant 0 : i32
    return %c0_i32, %c0_i32_0 : i32, i32
  }
  func.func @transform_11(%arg0: i32) -> (i32, i32) {
    %c0_i32 = arith.constant 0 : i32
    %c0_i32_0 = arith.constant 0 : i32
    %c0_i32_1 = arith.constant 0 : i32
    return %c0_i32, %c0_i32_0 : i32, i32
  }
  func.func @transform_12(%arg0: i32) -> (i32, i32) {
    %c0_i32 = arith.constant 0 : i32
    %c0_i32_0 = arith.constant 0 : i32
    %c0_i32_1 = arith.constant 0 : i32
    return %c0_i32, %c0_i32_0 : i32, i32
  }
  func.func @transform_13(%arg0: i32) -> (i32, i32) {
    %c0_i32 = arith.constant 0 : i32
    %c0_i32_0 = arith.constant 0 : i32
    return %arg0, %c0_i32 : i32, i32
  }
}

</mosaic_0001>

<bundles_post_ra>
// kernel: tpu_custom_call.1
= control target key start
LH: loop header
LB: loop body
LE: loop exit
PB: predicated region body
PF: predicated region fallthrough
CT: control target
= control target key end

     0   :  { %18 = vsyncpa [#allocation3], 0  ;;  %s1412_s0 = inlined_call_operand.hbm [shape: f32[16,128], index: 0, kind: input, shape index: {}]   ;;  %s1413_s1 = inlined_call_operand.hbm [shape: f32[128,128], index: 1, kind: input, shape index: {}]   ;;  %s1414_s2 = inlined_call_operand.vmem [shape: f32[1,128], index: 2, kind: input, shape index: {}]   ;;  %s1415_s3 = inlined_call_operand.hbm [shape: f32[128,128], index: 3, kind: input, shape index: {}]   ;;  %s1416_s4 = inlined_call_operand.vmem [shape: f32[1,128], index: 4, kind: input, shape index: {}]   ;;  %s1417_s5 = inlined_call_operand.hbm [shape: f32[128,128], index: 5, kind: input, shape index: {}]   ;;  %s1418_s6 = inlined_call_operand.vmem [shape: f32[1,128], index: 6, kind: input, shape index: {}]   ;;  %s1419_s7 = inlined_call_operand.hbm [shape: f32[128,128], index: 7, kind: input, shape index: {}]   ;;  %s1420_s8 = inlined_call_operand.vmem [shape: f32[1,128], index: 8, kind: input, shape index: {}]   ;;  %s1421_s9 = inlined_call_operand.hbm [shape: f32[128,128], index: 9, kind: input, shape index: {}]   ;;  %s1422_s10 = inlined_call_operand.vmem [shape: f32[1,128], index: 10, kind: input, shape index: {}]   ;;  %s1423_s11 = inlined_call_operand.hbm [shape: f32[128,128], index: 11, kind: input, shape index: {}]   ;;  %s1424_s12 = inlined_call_operand.vmem [shape: f32[1,128], index: 12, kind: input, shape index: {}]   ;;  %s1425_s13 = inlined_call_operand.hbm [shape: f32[16,128], index: 13, kind: output, shape index: {}]  }
   0x1   :  { %19 = vsyncpa [#allocation6], 0 }
   0x2   :  { %20 = vsyncpa [#allocation9], 0 }
   0x3   :  { %21 = vsyncpa [#allocation12], 0 }
   0x4   :  { %22 = vsyncpa [#allocation4], 0  ;;  %s1266_s25 = smov [#allocation5]   ;;  %s1267_s27 = smov [#allocation8]  }
   0x5   :  { %s40_s26 = sshll.u32 %s1266_s25, 4  ;;  %s68_s28 = sshll.u32 %s1267_s27, 4  ;;  %s41_s26 = int_to_ptr.vmem [resolvable:$true] %s40_s26  ;;  %s69_s28 = int_to_ptr.vmem [resolvable:$true] %s68_s28 }
   0x6   :  { %s1104_s29 = scalar_lea.vmem %s41_s26, 2048  ;;  %p1109_p1 = scmp.lt.s32.totalorder %s41_s26, %s41_s26 }
   0x7   :  { %p1105_p0 = scmp.ne.s32.totalorder %s41_s26, %s1104_s29  ;;  %p1110_p2 = scmp.lt.s32.totalorder %s1104_s29, %s1104_s29 }
   0x9   :  { %p1111_p3 = por %p1110_p2, %p1109_p1 }
   0xb   :  { %p1112_p4 = pnand %p1111_p3, %p1105_p0 }
   0xd   :  { %1115 = shalt.err (!%p1112_p4)
}
   0xe   :  { %s1268_s30 = smov 128   ;;  %s1269_s14 = smov 8  }
   0xf   :  { %46 = dma.hbm_to_vmem [thread:$0]  %s1413_s1, 2048, %s41_s26, [#allocation6], %s1268_s30, %s1268_s30, %s1269_s14  }
  0x10   :  { %s1124_s17 = scalar_lea.vmem %s69_s28, 2048  ;;  %p1129_p6 = scmp.lt.s32.totalorder %s69_s28, %s69_s28 }
  0x11   :  { %p1125_p5 = scmp.ne.s32.totalorder %s69_s28, %s1124_s17  ;;  %p1130_p7 = scmp.lt.s32.totalorder %s1124_s17, %s1124_s17 }
  0x13   :  { %p1131_p8 = por %p1130_p7, %p1129_p6 }
  0x15   :  { %p1132_p9 = pnand %p1131_p8, %p1125_p5 }
  0x17   :  { %1135 = shalt.err (!%p1132_p9)
}
  0x18   :  { %74 = dma.hbm_to_vmem [thread:$0]  %s1417_s5, 2048, %s69_s28, [#allocation9], %s1268_s30, %s1268_s30, %s1269_s14  }
  0x19   :  { %s1270_s20 = smov [#allocation11]   ;;  %s1271_s22 = smov [#allocation2]  }
  0x1a   :  { %s96_s21 = sshll.u32 %s1270_s20, 4  ;;  %s28_s23 = sshll.u32 %s1271_s22, 4  ;;  %s97_s21 = int_to_ptr.vmem [resolvable:$true] %s96_s21  ;;  %s29_s23 = int_to_ptr.vmem [resolvable:$true] %s28_s23 }
  0x1b   :  { %s1144_s1 = scalar_lea.vmem %s97_s21, 2048  ;;  %p1149_p11 = scmp.lt.s32.totalorder %s97_s21, %s97_s21 }
  0x1c   :  { %p1145_p10 = scmp.ne.s32.totalorder %s97_s21, %s1144_s1  ;;  %p1150_p12 = scmp.lt.s32.totalorder %s1144_s1, %s1144_s1 }
  0x1e   :  { %p1151_p13 = por %p1150_p12, %p1149_p11 }
  0x20   :  { %p1152_p0 = pnand %p1151_p13, %p1145_p10 }
  0x22   :  { %1155 = shalt.err (!%p1152_p0)
}
  0x23   :  { %102 = dma.hbm_to_vmem [thread:$0]  %s1421_s9, 2048, %s97_s21, [#allocation12], %s1268_s30, %s1268_s30, %s1269_s14  }
  0x24   :  { %s1164_s5 = scalar_lea.vmem %s29_s23, 256  ;;  %p1169_p2 = scmp.lt.s32.totalorder %s29_s23, %s29_s23 }
  0x25   :  { %p1165_p1 = scmp.ne.s32.totalorder %s29_s23, %s1164_s5  ;;  %p1170_p3 = scmp.lt.s32.totalorder %s1164_s5, %s1164_s5 }
  0x27   :  { %p1171_p4 = por %p1170_p3, %p1169_p2 }
  0x29   :  { %p1172_p5 = pnand %p1171_p4, %p1165_p1 }
  0x2b   :  { %1175 = shalt.err (!%p1172_p5)
}
  0x2c   :  { %34 = dma.hbm_to_vmem [thread:$0]  %s1412_s0, 256, %s29_s23, [#allocation3], %s1268_s30, %s1268_s30, %s1269_s14  }
  0x2d   :  { %s1272_s28 = smov [#allocation7]   ;;  %s1273_s15 = smov [#allocation10]  }
  0x2e   :  { %s54_s29 = sshll.u32 %s1272_s28, 4  ;;  %s82_s16 = sshll.u32 %s1273_s15, 4  ;;  %s55_s29 = int_to_ptr.vmem [resolvable:$true] %s54_s29  ;;  %s83_s16 = int_to_ptr.vmem [resolvable:$true] %s82_s16 }
  0x2f   :  { %s1184_s9 = scalar_lea.vmem %s55_s29, 2048  ;;  %p1189_p7 = scmp.lt.s32.totalorder %s55_s29, %s55_s29 }
  0x30   :  { %p1185_p6 = scmp.ne.s32.totalorder %s55_s29, %s1184_s9  ;;  %p1190_p8 = scmp.lt.s32.totalorder %s1184_s9, %s1184_s9 }
  0x32   :  { %p1191_p9 = por %p1190_p8, %p1189_p7 }
  0x34   :  { %p1192_p10 = pnand %p1191_p9, %p1185_p6 }
  0x36   :  { %1195 = shalt.err (!%p1192_p10)
}
  0x37   :  { %60 = dma.hbm_to_vmem [thread:$0]  %s1415_s3, 2048, %s55_s29, [#allocation6], %s1268_s30, %s1268_s30, %s1269_s14  }
  0x38   :  { %s1204_s0 = scalar_lea.vmem %s83_s16, 2048  ;;  %p1209_p12 = scmp.lt.s32.totalorder %s83_s16, %s83_s16 }
  0x39   :  { %p1205_p11 = scmp.ne.s32.totalorder %s83_s16, %s1204_s0  ;;  %p1210_p13 = scmp.lt.s32.totalorder %s1204_s0, %s1204_s0 }
  0x3b   :  { %p1211_p0 = por %p1210_p13, %p1209_p12 }
  0x3d   :  { %p1212_p1 = pnand %p1211_p0, %p1205_p11 }
  0x3f   :  { %1215 = shalt.err (!%p1212_p1)
}
  0x40   :  { %88 = dma.hbm_to_vmem [thread:$0]  %s1419_s7, 2048, %s83_s16, [#allocation9], %s1268_s30, %s1268_s30, %s1269_s14  }
  0x41   :  { %s1274_s21 = smov [#allocation13]  }
  0x42   :  { %s110_s22 = sshll.u32 %s1274_s21, 4  ;;  %s111_s22 = int_to_ptr.vmem [resolvable:$true] %s110_s22 }
  0x43   :  { %s1224_s23 = scalar_lea.vmem %s111_s22, 2048  ;;  %p1229_p3 = scmp.lt.s32.totalorder %s111_s22, %s111_s22 }
  0x44   :  { %p1225_p2 = scmp.ne.s32.totalorder %s111_s22, %s1224_s23  ;;  %p1230_p4 = scmp.lt.s32.totalorder %s1224_s23, %s1224_s23 }
  0x46   :  { %p1231_p5 = por %p1230_p4, %p1229_p3 }
  0x48   :  { %p1232_p6 = pnand %p1231_p5, %p1225_p2 }
  0x4a   :  { %1235 = shalt.err (!%p1232_p6)
}
  0x4b   :  { %116 = dma.hbm_to_vmem [thread:$0]  %s1423_s11, 2048, %s111_s22, [#allocation12], %s1268_s30, %s1268_s30, %s1269_s14  }
  0x4c   :  { %1256 = dma.done.wait [#allocation3], 256  }
  0x4d   :  { %1257 = vsyncadd [#allocation3], 4294967040 }
  0x4e   :  { %1258 = dma.done.wait [#allocation6], 4096  }
  0x4f   :  { %1259 = vsyncadd [#allocation6], 4294963200 }
  0x50   :  { %1260 = dma.done.wait [#allocation9], 4096  }
  0x51   :  { %1261 = vsyncadd [#allocation9], 4294963200 }
  0x52   :  { %1262 = dma.done.wait [#allocation12], 4096  }
  0x53   :  { %1263 = vsyncadd [#allocation12], 4294963200  ;;  %v157_v0 = vld [vmem:[#allocation5 + $0x78] sm:$0xff]  ;;  %v156_v1 = vld [vmem:[#allocation5 + $0x70] sm:$0xff]  ;;  %s1275_s29 = smov [#allocation14]  }
  0x54   :  { %876 = vmatprep.subr.mxu0 %v157_v0  ;;  %v155_v2 = vld [vmem:[#allocation5 + $0x68] sm:$0xff]  ;;  %v154_v3 = vld [vmem:[#allocation5 + $0x60] sm:$0xff]  ;;  %v140_v4 = vld [vmem:[#allocation2] sm:$0xff]  ;;  %s747_s15 = sshll.u32 %s1275_s29, 4  ;;  %s748_s15 = int_to_ptr.vmem [resolvable:$true] %s747_s15 }
  0x55   :  { %877 = vmatpush3.msra.mxu0 %v157_v0  ;;  %v153_v5 = vld [vmem:[#allocation5 + $0x58] sm:$0xff]  ;;  %908 = vmatprep.mubr.f32.mxu0 %v140_v4  ;;  %v256_v7 = vld [vmem:[#allocation7 + $0x70] sm:$0xff]  ;;  %v255_v9 = vld [vmem:[#allocation7 + $0x68] sm:$0xff]  ;;  %p1241_p8 = scmp.lt.s32.totalorder %s748_s15, %s748_s15 }
  0x56   :  { %878 = vmatprep.subr.mxu0 %v156_v1  ;;  %v257_v6 = vld [vmem:[#allocation7 + $0x78] sm:$0xff]  ;;  %v152_v8 = vld [vmem:[#allocation5 + $0x50] sm:$0xff]  ;;  %v151_v10 = vld [vmem:[#allocation5 + $0x48] sm:$0xff] }
  0x57   :  { %879 = vmatpush3.msra.mxu0 %v156_v1  ;;  %911 = vmatprep.subr.mxu1 %v257_v6  ;;  %v254_v11 = vld [vmem:[#allocation7 + $0x60] sm:$0xff]  ;;  %v253_v13 = vld [vmem:[#allocation7 + $0x58] sm:$0xff]  ;;  %v252_v15 = vld [vmem:[#allocation7 + $0x50] sm:$0xff] }
  0x58   :  { %880 = vmatprep.subr.mxu0 %v155_v2  ;;  %912 = vmatpush3.msra.mxu1 %v257_v6  ;;  %v150_v12 = vld [vmem:[#allocation5 + $0x40] sm:$0xff]  ;;  %v149_v14 = vld [vmem:[#allocation5 + $0x38] sm:$0xff]  ;;  %v148_v16 = vld [vmem:[#allocation5 + $0x30] sm:$0xff] }
  0x59   :  { %881 = vmatpush3.msra.mxu0 %v155_v2  ;;  %913 = vmatprep.subr.mxu1 %v256_v7  ;;  %v251_v17 = vld [vmem:[#allocation7 + $0x48] sm:$0xff]  ;;  %v250_v19 = vld [vmem:[#allocation7 + $0x40] sm:$0xff]  ;;  %v249_v21 = vld [vmem:[#allocation7 + $0x38] sm:$0xff] }
  0x5a   :  { %882 = vmatprep.subr.mxu0 %v154_v3  ;;  %914 = vmatpush3.msra.mxu1 %v256_v7  ;;  %v147_v18 = vld [vmem:[#allocation5 + $0x28] sm:$0xff]  ;;  %v146_v20 = vld [vmem:[#allocation5 + $0x20] sm:$0xff]  ;;  %v145_v22 = vld [vmem:[#allocation5 + $0x18] sm:$0xff] }
  0x5b   :  { %883 = vmatpush3.msra.mxu0 %v154_v3  ;;  %915 = vmatprep.subr.mxu1 %v255_v9  ;;  %v248_v23 = vld [vmem:[#allocation7 + $0x30] sm:$0xff]  ;;  %v247_v25 = vld [vmem:[#allocation7 + $0x28] sm:$0xff]  ;;  %v246_v27 = vld [vmem:[#allocation7 + $0x20] sm:$0xff] }
  0x5c   :  { %884 = vmatprep.subr.mxu0 %v153_v5  ;;  %916 = vmatpush3.msra.mxu1 %v255_v9  ;;  %v144_v24 = vld [vmem:[#allocation5 + $0x10] sm:$0xff]  ;;  %v143_v26 = vld [vmem:[#allocation5 + $0x8] sm:$0xff]  ;;  %v142_v28 = vld [vmem:[#allocation5] sm:$0xff] }
  0x5d   :  { %885 = vmatpush3.msra.mxu0 %v153_v5  ;;  %917 = vmatprep.subr.mxu1 %v254_v11  ;;  %v141_v29 = vld [vmem:[#allocation2 + $0x8] sm:$0xff]  ;;  %v244_v31 = vld [vmem:[#allocation7 + $0x10] sm:$0xff]  ;;  %v243_v32 = vld [vmem:[#allocation7 + $0x8] sm:$0xff] }
  0x5e   :  { %886 = vmatprep.subr.mxu0 %v152_v8  ;;  %918 = vmatpush3.msra.mxu1 %v254_v11  ;;  %v245_v30 = vld [vmem:[#allocation7 + $0x18] sm:$0xff]  ;;  %v242_v33 = vld [vmem:[#allocation7] sm:$0xff]  ;;  %v356_v35 = vld [vmem:[#allocation8 + $0x70] sm:$0xff] }
  0x5f   :  { %887 = vmatpush3.msra.mxu0 %v152_v8  ;;  %919 = vmatprep.subr.mxu1 %v253_v13  ;;  %v357_v34 = vld [vmem:[#allocation8 + $0x78] sm:$0xff]  ;;  %v355_v36 = vld [vmem:[#allocation8 + $0x68] sm:$0xff]  ;;  %v354_v37 = vld [vmem:[#allocation8 + $0x60] sm:$0xff] }
  0x60   :  { %888 = vmatprep.subr.mxu0 %v151_v10  ;;  %920 = vmatpush3.msra.mxu1 %v253_v13  ;;  %v353_v38 = vld [vmem:[#allocation8 + $0x58] sm:$0xff]  ;;  %v352_v39 = vld [vmem:[#allocation8 + $0x50] sm:$0xff]  ;;  %v351_v40 = vld [vmem:[#allocation8 + $0x48] sm:$0xff] }
  0x61   :  { %889 = vmatpush3.msra.mxu0 %v151_v10  ;;  %921 = vmatprep.subr.mxu1 %v252_v15  ;;  %v350_v41 = vld [vmem:[#allocation8 + $0x40] sm:$0xff]  ;;  %v349_v42 = vld [vmem:[#allocation8 + $0x38] sm:$0xff]  ;;  %v348_v43 = vld [vmem:[#allocation8 + $0x30] sm:$0xff] }
  0x62   :  { %890 = vmatprep.subr.mxu0 %v150_v12  ;;  %922 = vmatpush3.msra.mxu1 %v252_v15  ;;  %v347_v44 = vld [vmem:[#allocation8 + $0x28] sm:$0xff]  ;;  %v346_v45 = vld [vmem:[#allocation8 + $0x20] sm:$0xff]  ;;  %v762_v46 = vld [vmem:[%s1414_s2] ss:$0 sm:$0xff] }
  0x63   :  { %891 = vmatpush3.msra.mxu0 %v150_v12  ;;  %923 = vmatprep.subr.mxu1 %v251_v17  ;;  %v345_v53 = vld [vmem:[#allocation8 + $0x18] sm:$0xff]  ;;  %v344_v54 = vld [vmem:[#allocation8 + $0x10] sm:$0xff]  ;;  %v343_v55 = vld [vmem:[#allocation8 + $0x8] sm:$0xff] }
  0x64   :  { %892 = vmatprep.subr.mxu0 %v149_v14  ;;  %924 = vmatpush3.msra.mxu1 %v251_v17  ;;  %v342_v56 = vld [vmem:[#allocation8] sm:$0xff]  ;;  %v457_v57 = vld [vmem:[#allocation10 + $0x78] sm:$0xff]  ;;  %v456_v58 = vld [vmem:[#allocation10 + $0x70] sm:$0xff] }
  0x65   :  { %893 = vmatpush3.msra.mxu0 %v149_v14  ;;  %925 = vmatprep.subr.mxu1 %v250_v19  ;;  %v455_v59 = vld [vmem:[#allocation10 + $0x68] sm:$0xff]  ;;  %v454_v60 = vld [vmem:[#allocation10 + $0x60] sm:$0xff]  ;;  %v453_v61 = vld [vmem:[#allocation10 + $0x58] sm:$0xff] }
  0x66   :  { %894 = vmatprep.subr.mxu0 %v148_v16  ;;  %926 = vmatpush3.msra.mxu1 %v250_v19  ;;  %v452_v62 = vld [vmem:[#allocation10 + $0x50] sm:$0xff]  ;;  %v451_v63 = vld [vmem:[#allocation10 + $0x48] sm:$0xff]  ;;  %v450_v0 = vld [vmem:[#allocation10 + $0x40] sm:$0xff] }
  0x67   :  { %895 = vmatpush3.msra.mxu0 %v148_v16  ;;  %927 = vmatprep.subr.mxu1 %v249_v21  ;;  %v449_v1 = vld [vmem:[#allocation10 + $0x38] sm:$0xff]  ;;  %v448_v2 = vld [vmem:[#allocation10 + $0x30] sm:$0xff]  ;;  %v447_v3 = vld [vmem:[#allocation10 + $0x28] sm:$0xff] }
  0x68   :  { %896 = vmatprep.subr.mxu0 %v147_v18  ;;  %928 = vmatpush3.msra.mxu1 %v249_v21  ;;  %v446_v4 = vld [vmem:[#allocation10 + $0x20] sm:$0xff]  ;;  %v763_v5 = vld [vmem:[%s1416_s4] ss:$0 sm:$0xff]  ;;  %v445_v12 = vld [vmem:[#allocation10 + $0x18] sm:$0xff] }
  0x69   :  { %897 = vmatpush3.msra.mxu0 %v147_v18  ;;  %929 = vmatprep.subr.mxu1 %v248_v23  ;;  %v444_v13 = vld [vmem:[#allocation10 + $0x10] sm:$0xff]  ;;  %v443_v14 = vld [vmem:[#allocation10 + $0x8] sm:$0xff]  ;;  %v442_v15 = vld [vmem:[#allocation10] sm:$0xff] }
  0x6a   :  { %898 = vmatprep.subr.mxu0 %v146_v20  ;;  %930 = vmatpush3.msra.mxu1 %v248_v23  ;;  %v557_v16 = vld [vmem:[#allocation11 + $0x78] sm:$0xff]  ;;  %v556_v17 = vld [vmem:[#allocation11 + $0x70] sm:$0xff]  ;;  %v555_v18 = vld [vmem:[#allocation11 + $0x68] sm:$0xff] }
  0x6b   :  { %899 = vmatpush3.msra.mxu0 %v146_v20  ;;  %931 = vmatprep.subr.mxu1 %v247_v25  ;;  %v554_v19 = vld [vmem:[#allocation11 + $0x60] sm:$0xff]  ;;  %v553_v20 = vld [vmem:[#allocation11 + $0x58] sm:$0xff]  ;;  %v552_v21 = vld [vmem:[#allocation11 + $0x50] sm:$0xff] }
  0x6c   :  { %900 = vmatprep.subr.mxu0 %v145_v22  ;;  %932 = vmatpush3.msra.mxu1 %v247_v25  ;;  %v550_v23 = vld [vmem:[#allocation11 + $0x40] sm:$0xff]  ;;  %v548_v25 = vld [vmem:[#allocation11 + $0x30] sm:$0xff] }
  0x6d   :  { %901 = vmatpush3.msra.mxu0 %v145_v22  ;;  %933 = vmatprep.subr.mxu1 %v246_v27  ;;  %v551_v22 = vld [vmem:[#allocation11 + $0x48] sm:$0xff] }
  0x6e   :  { %902 = vmatprep.subr.mxu0 %v144_v24  ;;  %934 = vmatpush3.msra.mxu1 %v246_v27  ;;  %v546_v27 = vld [vmem:[#allocation11 + $0x20] sm:$0xff] }
  0x6f   :  { %903 = vmatpush3.msra.mxu0 %v144_v24  ;;  %935 = vmatprep.subr.mxu1 %v245_v30  ;;  %v549_v24 = vld [vmem:[#allocation11 + $0x38] sm:$0xff] }
  0x70   :  { %904 = vmatprep.subr.mxu0 %v143_v26  ;;  %936 = vmatpush3.msra.mxu1 %v245_v30 }
  0x71   :  { %905 = vmatpush3.msra.mxu0 %v143_v26  ;;  %937 = vmatprep.subr.mxu1 %v244_v31  ;;  %v547_v26 = vld [vmem:[#allocation11 + $0x28] sm:$0xff] }
  0x72   :  { %906 = vmatprep.subr.mxu0 %v142_v28  ;;  %938 = vmatpush3.msra.mxu1 %v244_v31 }
  0x73   :  { %907 = vmatpush3.msra.mxu0 %v142_v28  ;;  %939 = vmatprep.subr.mxu1 %v243_v32  ;;  %v764_v28 = vld [vmem:[%s1418_s6] ss:$0 sm:$0xff] }
  0x74   :  { %909 = vmatmul.mubr.f32.vlgmr.msra.gmra.mxu0 %v141_v29  ;;  %940 = vmatpush3.msra.mxu1 %v243_v32 }
  0x75   :  { %941 = vmatprep.subr.mxu1 %v242_v33  ;;  %946 = vmatprep.subr.mxu0 %v357_v34 }
  0x76   :  { %942 = vmatpush3.msra.mxu1 %v242_v33  ;;  %947 = vmatpush3.msra.mxu0 %v357_v34 }
  0x77   :  { %948 = vmatprep.subr.mxu0 %v356_v35  ;;  %981 = vmatprep.subr.mxu1 %v457_v57 }
  0x78   :  { %949 = vmatpush3.msra.mxu0 %v356_v35  ;;  %v545_v35 = vld [vmem:[#allocation11 + $0x18] sm:$0xff] }
  0x79   :  { %950 = vmatprep.subr.mxu0 %v355_v36 }
  0x7a   :  { %951 = vmatpush3.msra.mxu0 %v355_v36  ;;  %v544_v36 = vld [vmem:[#allocation11 + $0x10] sm:$0xff] }
  0x7b   :  { %952 = vmatprep.subr.mxu0 %v354_v37 }
  0x7c   :  { %953 = vmatpush3.msra.mxu0 %v354_v37  ;;  %v543_v37 = vld [vmem:[#allocation11 + $0x8] sm:$0xff] }
  0x7d   :  { %954 = vmatprep.subr.mxu0 %v353_v38 }
  0x7e   :  { %955 = vmatpush3.msra.mxu0 %v353_v38  ;;  %v542_v38 = vld [vmem:[#allocation11] sm:$0xff] }
  0x7f   :  { %956 = vmatprep.subr.mxu0 %v352_v39 }
  0x80   :  { %957 = vmatpush3.msra.mxu0 %v352_v39  ;;  %v657_v39 = vld [vmem:[#allocation13 + $0x78] sm:$0xff] }
  0x81   :  { %958 = vmatprep.subr.mxu0 %v351_v40 }
  0x82   :  { %959 = vmatpush3.msra.mxu0 %v351_v40  ;;  %v656_v40 = vld [vmem:[#allocation13 + $0x70] sm:$0xff] }
  0x83   :  { %960 = vmatprep.subr.mxu0 %v350_v41 }
  0x84   :  { %961 = vmatpush3.msra.mxu0 %v350_v41  ;;  %v655_v41 = vld [vmem:[#allocation13 + $0x68] sm:$0xff] }
  0x85   :  { %962 = vmatprep.subr.mxu0 %v349_v42 }
  0x86   :  { %963 = vmatpush3.msra.mxu0 %v349_v42  ;;  %v654_v42 = vld [vmem:[#allocation13 + $0x60] sm:$0xff] }
  0x87   :  { %964 = vmatprep.subr.mxu0 %v348_v43 }
  0x88   :  { %965 = vmatpush3.msra.mxu0 %v348_v43  ;;  %v653_v43 = vld [vmem:[#allocation13 + $0x58] sm:$0xff] }
  0x89   :  { %966 = vmatprep.subr.mxu0 %v347_v44 }
  0x8a   :  { %967 = vmatpush3.msra.mxu0 %v347_v44  ;;  %v652_v44 = vld [vmem:[#allocation13 + $0x50] sm:$0xff] }
  0x8b   :  { %968 = vmatprep.subr.mxu0 %v346_v45 }
  0x8c   :  { %969 = vmatpush3.msra.mxu0 %v346_v45  ;;  %v651_v45 = vld [vmem:[#allocation13 + $0x48] sm:$0xff] }
  0x8d   :  { %970 = vmatprep.subr.mxu0 %v345_v53 }
  0x8e   :  { %971 = vmatpush3.msra.mxu0 %v345_v53 }
  0x8f   :  { %972 = vmatprep.subr.mxu0 %v344_v54 }
  0x90   :  { %973 = vmatpush3.msra.mxu0 %v344_v54 }
  0x91   :  { %974 = vmatprep.subr.mxu0 %v343_v55 }
  0x92   :  { %975 = vmatpush3.msra.mxu0 %v343_v55 }
  0x93   :  { %976 = vmatprep.subr.mxu0 %v342_v56 }
  0x94   :  { %977 = vmatpush3.msra.mxu0 %v342_v56 }
  0x95   :  { %1016 = vmatprep.subr.mxu0 %v557_v16 }
 0x134   :  { %v910_v47 = vpop.f32.mrf.mxu0 }
 0x135   :  { %v237_v48 = vadd.f32 %v910_v47, %v762_v46  ;;  %v649_v47 = vld [vmem:[#allocation13 + $0x38] sm:$0xff] }
 0x136   :  { %v231_v49 = vpop.f32.mrf.mxu0 }
 0x137   :  { %v232_v50 = vadd.f32 %v762_v46, %v231_v49  ;;  %v241_v52 = vmax.f32 %v237_v48, 0.0  ;;  %v650_v46 = vld [vmem:[#allocation13 + $0x40] sm:$0xff]  ;;  %v648_v48 = vld [vmem:[#allocation13 + $0x30] sm:$0xff]  ;;  %v647_v49 = vld [vmem:[#allocation13 + $0x28] sm:$0xff] }
 0x139   :  { %v240_v51 = vmax.f32 %v232_v50, 0.0  ;;  %v646_v50 = vld [vmem:[#allocation13 + $0x20] sm:$0xff] }
 0x13b   :  { %943 = vmatprep.mubr.f32.mxu1 %v240_v51  ;;  %v765_v51 = vld [vmem:[%s1420_s8] ss:$0 sm:$0xff] }
 0x13c   :  { %944 = vmatmul.mubr.f32.vlgmr.msra.gmra.mxu1 %v241_v52 }
 0x13d   :  { %982 = vmatpush3.msra.mxu1 %v457_v57 }
 0x13e   :  { %983 = vmatprep.subr.mxu1 %v456_v58 }
 0x13f   :  { %984 = vmatpush3.msra.mxu1 %v456_v58  ;;  %v645_v58 = vld [vmem:[#allocation13 + $0x18] sm:$0xff] }
 0x140   :  { %985 = vmatprep.subr.mxu1 %v455_v59 }
 0x141   :  { %986 = vmatpush3.msra.mxu1 %v455_v59  ;;  %v644_v59 = vld [vmem:[#allocation13 + $0x10] sm:$0xff] }
 0x142   :  { %987 = vmatprep.subr.mxu1 %v454_v60 }
 0x143   :  { %988 = vmatpush3.msra.mxu1 %v454_v60  ;;  %v643_v60 = vld [vmem:[#allocation13 + $0x8] sm:$0xff] }
 0x144   :  { %989 = vmatprep.subr.mxu1 %v453_v61 }
 0x145   :  { %990 = vmatpush3.msra.mxu1 %v453_v61  ;;  %v642_v61 = vld [vmem:[#allocation13] sm:$0xff] }
 0x146   :  { %991 = vmatprep.subr.mxu1 %v452_v62 }
 0x147   :  { %992 = vmatpush3.msra.mxu1 %v452_v62  ;;  %v766_v62 = vld [vmem:[%s1422_s10] ss:$0 sm:$0xff]  ;;  %s1236_s10 = scalar_lea.vmem %s748_s15, 256 }
 0x148   :  { %993 = vmatprep.subr.mxu1 %v451_v63  ;;  %p1237_p7 = scmp.ne.s32.totalorder %s748_s15, %s1236_s10  ;;  %p1242_p9 = scmp.lt.s32.totalorder %s1236_s10, %s1236_s10 }
 0x149   :  { %994 = vmatpush3.msra.mxu1 %v451_v63 }
 0x14a   :  { %995 = vmatprep.subr.mxu1 %v450_v0  ;;  %p1243_p10 = por %p1242_p9, %p1241_p8 }
 0x14b   :  { %996 = vmatpush3.msra.mxu1 %v450_v0 }
 0x14c   :  { %997 = vmatprep.subr.mxu1 %v449_v1  ;;  %p1244_p11 = pnand %p1243_p10, %p1237_p7 }
 0x14d   :  { %998 = vmatpush3.msra.mxu1 %v449_v1 }
 0x14e   :  { %999 = vmatprep.subr.mxu1 %v448_v2 }
 0x14f   :  { %1000 = vmatpush3.msra.mxu1 %v448_v2 }
 0x150   :  { %1001 = vmatprep.subr.mxu1 %v447_v3 }
 0x151   :  { %1002 = vmatpush3.msra.mxu1 %v447_v3 }
 0x152   :  { %1003 = vmatprep.subr.mxu1 %v446_v4 }
 0x153   :  { %1004 = vmatpush3.msra.mxu1 %v446_v4 }
 0x154   :  { %1005 = vmatprep.subr.mxu1 %v445_v12 }
 0x155   :  { %1006 = vmatpush3.msra.mxu1 %v445_v12 }
 0x156   :  { %1007 = vmatprep.subr.mxu1 %v444_v13 }
 0x157   :  { %1008 = vmatpush3.msra.mxu1 %v444_v13 }
 0x158   :  { %1009 = vmatprep.subr.mxu1 %v443_v14 }
 0x159   :  { %1010 = vmatpush3.msra.mxu1 %v443_v14 }
 0x15a   :  { %1011 = vmatprep.subr.mxu1 %v442_v15 }
 0x15b   :  { %1012 = vmatpush3.msra.mxu1 %v442_v15 }
 0x15c   :  { %1051 = vmatprep.subr.mxu1 %v657_v39 }
 0x1fc   :  { %v945_v6 = vpop.f32.mrf.mxu1 }
 0x1fd   :  { %v337_v7 = vadd.f32 %v945_v6, %v763_v5 }
 0x1fe   :  { %v331_v8 = vpop.f32.mrf.mxu1 }
 0x1ff   :  { %v332_v9 = vadd.f32 %v763_v5, %v331_v8  ;;  %v341_v11 = vmax.f32 %v337_v7, 0.0  ;;  %v767_v5 = vld [vmem:[%s1424_s12] ss:$0 sm:$0xff] }
 0x201   :  { %v340_v10 = vmax.f32 %v332_v9, 0.0 }
 0x203   :  { %978 = vmatprep.mubr.f32.mxu0 %v340_v10 }
 0x204   :  { %979 = vmatmul.mubr.f32.vlgmr.msra.gmra.mxu0 %v341_v11 }
 0x205   :  { %1017 = vmatpush3.msra.mxu0 %v557_v16 }
 0x206   :  { %1018 = vmatprep.subr.mxu0 %v556_v17 }
 0x207   :  { %1019 = vmatpush3.msra.mxu0 %v556_v17 }
 0x208   :  { %1020 = vmatprep.subr.mxu0 %v555_v18 }
 0x209   :  { %1021 = vmatpush3.msra.mxu0 %v555_v18 }
 0x20a   :  { %1022 = vmatprep.subr.mxu0 %v554_v19 }
 0x20b   :  { %1023 = vmatpush3.msra.mxu0 %v554_v19 }
 0x20c   :  { %1024 = vmatprep.subr.mxu0 %v553_v20 }
 0x20d   :  { %1025 = vmatpush3.msra.mxu0 %v553_v20 }
 0x20e   :  { %1026 = vmatprep.subr.mxu0 %v552_v21 }
 0x20f   :  { %1027 = vmatpush3.msra.mxu0 %v552_v21 }
 0x210   :  { %1028 = vmatprep.subr.mxu0 %v551_v22 }
 0x211   :  { %1029 = vmatpush3.msra.mxu0 %v551_v22 }
 0x212   :  { %1030 = vmatprep.subr.mxu0 %v550_v23 }
 0x213   :  { %1031 = vmatpush3.msra.mxu0 %v550_v23 }
 0x214   :  { %1032 = vmatprep.subr.mxu0 %v549_v24 }
 0x215   :  { %1033 = vmatpush3.msra.mxu0 %v549_v24 }
 0x216   :  { %1034 = vmatprep.subr.mxu0 %v548_v25 }
 0x217   :  { %1035 = vmatpush3.msra.mxu0 %v548_v25 }
 0x218   :  { %1036 = vmatprep.subr.mxu0 %v547_v26 }
 0x219   :  { %1037 = vmatpush3.msra.mxu0 %v547_v26 }
 0x21a   :  { %1038 = vmatprep.subr.mxu0 %v546_v27 }
 0x21b   :  { %1039 = vmatpush3.msra.mxu0 %v546_v27 }
 0x21c   :  { %1040 = vmatprep.subr.mxu0 %v545_v35 }
 0x21d   :  { %1041 = vmatpush3.msra.mxu0 %v545_v35 }
 0x21e   :  { %1042 = vmatprep.subr.mxu0 %v544_v36 }
 0x21f   :  { %1043 = vmatpush3.msra.mxu0 %v544_v36 }
 0x220   :  { %1044 = vmatprep.subr.mxu0 %v543_v37 }
 0x221   :  { %1045 = vmatpush3.msra.mxu0 %v543_v37 }
 0x222   :  { %1046 = vmatprep.subr.mxu0 %v542_v38 }
 0x223   :  { %1047 = vmatpush3.msra.mxu0 %v542_v38 }
 0x2c4   :  { %v980_v29 = vpop.f32.mrf.mxu0 }
 0x2c5   :  { %v437_v30 = vadd.f32 %v980_v29, %v764_v28 }
 0x2c6   :  { %v431_v31 = vpop.f32.mrf.mxu0 }
 0x2c7   :  { %v432_v32 = vadd.f32 %v764_v28, %v431_v31  ;;  %v441_v34 = vmax.f32 %v437_v30, 0.0 }
 0x2c9   :  { %v440_v33 = vmax.f32 %v432_v32, 0.0 }
 0x2cb   :  { %1013 = vmatprep.mubr.f32.mxu1 %v440_v33 }
 0x2cc   :  { %1014 = vmatmul.mubr.f32.vlgmr.msra.gmra.mxu1 %v441_v34 }
 0x2cd   :  { %1052 = vmatpush3.msra.mxu1 %v657_v39 }
 0x2ce   :  { %1053 = vmatprep.subr.mxu1 %v656_v40 }
 0x2cf   :  { %1054 = vmatpush3.msra.mxu1 %v656_v40 }
 0x2d0   :  { %1055 = vmatprep.subr.mxu1 %v655_v41 }
 0x2d1   :  { %1056 = vmatpush3.msra.mxu1 %v655_v41 }
 0x2d2   :  { %1057 = vmatprep.subr.mxu1 %v654_v42 }
 0x2d3   :  { %1058 = vmatpush3.msra.mxu1 %v654_v42 }
 0x2d4   :  { %1059 = vmatprep.subr.mxu1 %v653_v43 }
 0x2d5   :  { %1060 = vmatpush3.msra.mxu1 %v653_v43 }
 0x2d6   :  { %1061 = vmatprep.subr.mxu1 %v652_v44 }
 0x2d7   :  { %1062 = vmatpush3.msra.mxu1 %v652_v44 }
 0x2d8   :  { %1063 = vmatprep.subr.mxu1 %v651_v45 }
 0x2d9   :  { %1064 = vmatpush3.msra.mxu1 %v651_v45 }
 0x2da   :  { %1065 = vmatprep.subr.mxu1 %v650_v46 }
 0x2db   :  { %1066 = vmatpush3.msra.mxu1 %v650_v46 }
 0x2dc   :  { %1067 = vmatprep.subr.mxu1 %v649_v47 }
 0x2dd   :  { %1068 = vmatpush3.msra.mxu1 %v649_v47 }
 0x2de   :  { %1069 = vmatprep.subr.mxu1 %v648_v48 }
 0x2df   :  { %1070 = vmatpush3.msra.mxu1 %v648_v48 }
 0x2e0   :  { %1071 = vmatprep.subr.mxu1 %v647_v49 }
 0x2e1   :  { %1072 = vmatpush3.msra.mxu1 %v647_v49 }
 0x2e2   :  { %1073 = vmatprep.subr.mxu1 %v646_v50 }
 0x2e3   :  { %1074 = vmatpush3.msra.mxu1 %v646_v50 }
 0x2e4   :  { %1075 = vmatprep.subr.mxu1 %v645_v58 }
 0x2e5   :  { %1076 = vmatpush3.msra.mxu1 %v645_v58 }
 0x2e6   :  { %1077 = vmatprep.subr.mxu1 %v644_v59 }
 0x2e7   :  { %1078 = vmatpush3.msra.mxu1 %v644_v59 }
 0x2e8   :  { %1079 = vmatprep.subr.mxu1 %v643_v60 }
 0x2e9   :  { %1080 = vmatpush3.msra.mxu1 %v643_v60 }
 0x2ea   :  { %1081 = vmatprep.subr.mxu1 %v642_v61 }
 0x2eb   :  { %1082 = vmatpush3.msra.mxu1 %v642_v61 }
 0x38c   :  { %v1015_v52 = vpop.f32.mrf.mxu1 }
 0x38d   :  { %v537_v53 = vadd.f32 %v1015_v52, %v765_v51 }
 0x38e   :  { %v531_v54 = vpop.f32.mrf.mxu1 }
 0x38f   :  { %v532_v55 = vadd.f32 %v765_v51, %v531_v54  ;;  %v541_v57 = vmax.f32 %v537_v53, 0.0 }
 0x391   :  { %v540_v56 = vmax.f32 %v532_v55, 0.0 }
 0x393   :  { %1048 = vmatprep.mubr.f32.mxu0 %v540_v56 }
 0x394   :  { %1049 = vmatmul.mubr.f32.vlgmr.msra.gmra.mxu0 %v541_v57 }
 0x454   :  { %v1050_v63 = vpop.f32.mrf.mxu0 }
 0x455   :  { %v637_v0 = vadd.f32 %v1050_v63, %v766_v62 }
 0x456   :  { %v631_v1 = vpop.f32.mrf.mxu0 }
 0x457   :  { %v632_v2 = vadd.f32 %v766_v62, %v631_v1  ;;  %v641_v4 = vmax.f32 %v637_v0, 0.0 }
 0x459   :  { %v640_v3 = vmax.f32 %v632_v2, 0.0 }
 0x45b   :  { %1083 = vmatprep.mubr.f32.mxu1 %v640_v3 }
 0x45c   :  { %1084 = vmatmul.mubr.f32.vlgmr.msra.gmra.mxu1 %v641_v4 }
 0x51c   :  { %v1085_v6 = vpop.f32.mrf.mxu1 }
 0x51d   :  { %v737_v7 = vadd.f32 %v1085_v6, %v767_v5 }
 0x51e   :  { %v731_v8 = vpop.f32.mrf.mxu1 }
 0x51f   :  { %741 = vst [vmem:[#allocation14 + $0x8] sm:$0xff] %v737_v7  ;;  %v732_v9 = vadd.f32 %v767_v5, %v731_v8 }
 0x521   :  { %740 = vst [vmem:[#allocation14] sm:$0xff] %v732_v9 }
 0x522   :  { %1247 = shalt.err (!%p1244_p11)
}
 0x523   :  { %753 = dma.vmem_to_hbm [thread:$0]  %s748_s15, 256, %s1425_s13, [#allocation4], %s1268_s30, %s1268_s30, %s1269_s14  }
 0x524   :  { %1264 = dma.done.wait [#allocation4], 256  }
 0x525   :  { %1265 = vsyncadd [#allocation4], 4294967040 }
 0x526   :  { %757 = vsyncpa [#allocation3], 1 }
 0x527   :  { %758 = vsyncpa [#allocation6], 1 }
 0x528   :  { %759 = vsyncpa [#allocation9], 1 }
 0x529   :  { %760 = vsyncpa [#allocation12], 1 }
 0x52a   :  { %761 = vsyncpa [#allocation4], 1 }

// kernel: tpu_custom_call.1
= control target key start
LH: loop header
LB: loop body
LE: loop exit
PB: predicated region body
PF: predicated region fallthrough
CT: control target
= control target key end

     0   :  { %18 = vsyncpa [#allocation3], 0  ;;  %s1412_s0 = inlined_call_operand.hbm [shape: f32[16,128], index: 0, kind: input, shape index: {}]   ;;  %s1413_s1 = inlined_call_operand.hbm [shape: f32[128,128], index: 1, kind: input, shape index: {}]   ;;  %s1414_s2 = inlined_call_operand.vmem [shape: f32[1,128], index: 2, kind: input, shape index: {}]   ;;  %s1415_s3 = inlined_call_operand.hbm [shape: f32[128,128], index: 3, kind: input, shape index: {}]   ;;  %s1416_s4 = inlined_call_operand.vmem [shape: f32[1,128], index: 4, kind: input, shape index: {}]   ;;  %s1417_s5 = inlined_call_operand.hbm [shape: f32[128,128], index: 5, kind: input, shape index: {}]   ;;  %s1418_s6 = inlined_call_operand.vmem [shape: f32[1,128], index: 6, kind: input, shape index: {}]   ;;  %s1419_s7 = inlined_call_operand.hbm [shape: f32[128,128], index: 7, kind: input, shape index: {}]   ;;  %s1420_s8 = inlined_call_operand.vmem [shape: f32[1,128], index: 8, kind: input, shape index: {}]   ;;  %s1421_s9 = inlined_call_operand.hbm [shape: f32[128,128], index: 9, kind: input, shape index: {}]   ;;  %s1422_s10 = inlined_call_operand.vmem [shape: f32[1,128], index: 10, kind: input, shape index: {}]   ;;  %s1423_s11 = inlined_call_operand.hbm [shape: f32[128,128], index: 11, kind: input, shape index: {}]   ;;  %s1424_s12 = inlined_call_operand.vmem [shape: f32[1,128], index: 12, kind: input, shape index: {}]   ;;  %s1425_s13 = inlined_call_operand.hbm [shape: f32[16,128], index: 13, kind: output, shape index: {}]  }
   0x1   :  { %19 = vsyncpa [#allocation6], 0 }
   0x2   :  { %20 = vsyncpa [#allocation9], 0 }
   0x3   :  { %21 = vsyncpa [#allocation12], 0 }
   0x4   :  { %22 = vsyncpa [#allocation4], 0  ;;  %s1266_s25 = smov [#allocation5]   ;;  %s1267_s27 = smov [#allocation8]  }
   0x5   :  { %s40_s26 = sshll.u32 %s1266_s25, 4  ;;  %s68_s28 = sshll.u32 %s1267_s27, 4  ;;  %s41_s26 = int_to_ptr.vmem [resolvable:$true] %s40_s26  ;;  %s69_s28 = int_to_ptr.vmem [resolvable:$true] %s68_s28 }
   0x6   :  { %s1104_s29 = scalar_lea.vmem %s41_s26, 2048  ;;  %p1109_p1 = scmp.lt.s32.totalorder %s41_s26, %s41_s26 }
   0x7   :  { %p1105_p0 = scmp.ne.s32.totalorder %s41_s26, %s1104_s29  ;;  %p1110_p2 = scmp.lt.s32.totalorder %s1104_s29, %s1104_s29 }
   0x9   :  { %p1111_p3 = por %p1110_p2, %p1109_p1 }
   0xb   :  { %p1112_p4 = pnand %p1111_p3, %p1105_p0 }
   0xd   :  { %1115 = shalt.err (!%p1112_p4)
}
   0xe   :  { %s1268_s30 = smov 128   ;;  %s1269_s14 = smov 8  }
   0xf   :  { %46 = dma.hbm_to_vmem [thread:$0]  %s1413_s1, 2048, %s41_s26, [#allocation6], %s1268_s30, %s1268_s30, %s1269_s14  }
  0x10   :  { %s1124_s17 = scalar_lea.vmem %s69_s28, 2048  ;;  %p1129_p6 = scmp.lt.s32.totalorder %s69_s28, %s69_s28 }
  0x11   :  { %p1125_p5 = scmp.ne.s32.totalorder %s69_s28, %s1124_s17  ;;  %p1130_p7 = scmp.lt.s32.totalorder %s1124_s17, %s1124_s17 }
  0x13   :  { %p1131_p8 = por %p1130_p7, %p1129_p6 }
  0x15   :  { %p1132_p9 = pnand %p1131_p8, %p1125_p5 }
  0x17   :  { %1135 = shalt.err (!%p1132_p9)
}
  0x18   :  { %74 = dma.hbm_to_vmem [thread:$0]  %s1417_s5, 2048, %s69_s28, [#allocation9], %s1268_s30, %s1268_s30, %s1269_s14  }
  0x19   :  { %s1270_s20 = smov [#allocation11]   ;;  %s1271_s22 = smov [#allocation2]  }
  0x1a   :  { %s96_s21 = sshll.u32 %s1270_s20, 4  ;;  %s28_s23 = sshll.u32 %s1271_s22, 4  ;;  %s97_s21 = int_to_ptr.vmem [resolvable:$true] %s96_s21  ;;  %s29_s23 = int_to_ptr.vmem [resolvable:$true] %s28_s23 }
  0x1b   :  { %s1144_s1 = scalar_lea.vmem %s97_s21, 2048  ;;  %p1149_p11 = scmp.lt.s32.totalorder %s97_s21, %s97_s21 }
  0x1c   :  { %p1145_p10 = scmp.ne.s32.totalorder %s97_s21, %s1144_s1  ;;  %p1150_p12 = scmp.lt.s32.totalorder %s1144_s1, %s1144_s1 }
  0x1e   :  { %p1151_p13 = por %p1150_p12, %p1149_p11 }
  0x20   :  { %p1152_p0 = pnand %p1151_p13, %p1145_p10 }
  0x22   :  { %1155 = shalt.err (!%p1152_p0)
}
  0x23   :  { %102 = dma.hbm_to_vmem [thread:$0]  %s1421_s9, 2048, %s97_s21, [#allocation12], %s1268_s30, %s1268_s30, %s1269_s14  }
  0x24   :  { %s1164_s5 = scalar_lea.vmem %s29_s23, 256  ;;  %p1169_p2 = scmp.lt.s32.totalorder %s29_s23, %s29_s23 }
  0x25   :  { %p1165_p1 = scmp.ne.s32.totalorder %s29_s23, %s1164_s5  ;;  %p1170_p3 = scmp.lt.s32.totalorder %s1164_s5, %s1164_s5 }
  0x27   :  { %p1171_p4 = por %p1170_p3, %p1169_p2 }
  0x29   :  { %p1172_p5 = pnand %p1171_p4, %p1165_p1 }
  0x2b   :  { %1175 = shalt.err (!%p1172_p5)
}
  0x2c   :  { %34 = dma.hbm_to_vmem [thread:$0]  %s1412_s0, 256, %s29_s23, [#allocation3], %s1268_s30, %s1268_s30, %s1269_s14  }
  0x2d   :  { %s1272_s28 = smov [#allocation7]   ;;  %s1273_s15 = smov [#allocation10]  }
  0x2e   :  { %s54_s29 = sshll.u32 %s1272_s28, 4  ;;  %s82_s16 = sshll.u32 %s1273_s15, 4  ;;  %s55_s29 = int_to_ptr.vmem [resolvable:$true] %s54_s29  ;;  %s83_s16 = int_to_ptr.vmem [resolvable:$true] %s82_s16 }
  0x2f   :  { %s1184_s9 = scalar_lea.vmem %s55_s29, 2048  ;;  %p1189_p7 = scmp.lt.s32.totalorder %s55_s29, %s55_s29 }
  0x30   :  { %p1185_p6 = scmp.ne.s32.totalorder %s55_s29, %s1184_s9  ;;  %p1190_p8 = scmp.lt.s32.totalorder %s1184_s9, %s1184_s9 }
  0x32   :  { %p1191_p9 = por %p1190_p8, %p1189_p7 }
  0x34   :  { %p1192_p10 = pnand %p1191_p9, %p1185_p6 }
  0x36   :  { %1195 = shalt.err (!%p1192_p10)
}
  0x37   :  { %60 = dma.hbm_to_vmem [thread:$0]  %s1415_s3, 2048, %s55_s29, [#allocation6], %s1268_s30, %s1268_s30, %s1269_s14  }
  0x38   :  { %s1204_s0 = scalar_lea.vmem %s83_s16, 2048  ;;  %p1209_p12 = scmp.lt.s32.totalorder %s83_s16, %s83_s16 }
  0x39   :  { %p1205_p11 = scmp.ne.s32.totalorder %s83_s16, %s1204_s0  ;;  %p1210_p13 = scmp.lt.s32.totalorder %s1204_s0, %s1204_s0 }
  0x3b   :  { %p1211_p0 = por %p1210_p13, %p1209_p12 }
  0x3d   :  { %p1212_p1 = pnand %p1211_p0, %p1205_p11 }
  0x3f   :  { %1215 = shalt.err (!%p1212_p1)
}
  0x40   :  { %88 = dma.hbm_to_vmem [thread:$0]  %s1419_s7, 2048, %s83_s16, [#allocation9], %s1268_s30, %s1268_s30, %s1269_s14  }
  0x41   :  { %s1274_s21 = smov [#allocation13]  }
  0x42   :  { %s110_s22 = sshll.u32 %s1274_s21, 4  ;;  %s111_s22 = int_to_ptr.vmem [resolvable:$true] %s110_s22 }
  0x43   :  { %s1224_s23 = scalar_lea.vmem %s111_s22, 2048  ;;  %p1229_p3 = scmp.lt.s32.totalorder %s111_s22, %s111_s22 }
  0x44   :  { %p1225_p2 = scmp.ne.s32.totalorder %s111_s22, %s1224_s23  ;;  %p1230_p4 = scmp.lt.s32.totalorder %s1224_s23, %s1224_s23 }
  0x46   :  { %p1231_p5 = por %p1230_p4, %p1229_p3 }
  0x48   :  { %p1232_p6 = pnand %p1231_p5, %p1225_p2 }
  0x4a   :  { %1235 = shalt.err (!%p1232_p6)
}
  0x4b   :  { %116 = dma.hbm_to_vmem [thread:$0]  %s1423_s11, 2048, %s111_s22, [#allocation12], %s1268_s30, %s1268_s30, %s1269_s14  }
  0x4c   :  { %1256 = dma.done.wait [#allocation3], 256  }
  0x4d   :  { %1257 = vsyncadd [#allocation3], 4294967040 }
  0x4e   :  { %1258 = dma.done.wait [#allocation6], 4096  }
  0x4f   :  { %1259 = vsyncadd [#allocation6], 4294963200 }
  0x50   :  { %1260 = dma.done.wait [#allocation9], 4096  }
  0x51   :  { %1261 = vsyncadd [#allocation9], 4294963200 }
  0x52   :  { %1262 = dma.done.wait [#allocation12], 4096  }
  0x53   :  { %1263 = vsyncadd [#allocation12], 4294963200  ;;  %v157_v0 = vld [vmem:[#allocation5 + $0x78] sm:$0xff]  ;;  %v156_v1 = vld [vmem:[#allocation5 + $0x70] sm:$0xff]  ;;  %s1275_s29 = smov [#allocation14]  }
  0x54   :  { %876 = vmatprep.subr.mxu0 %v157_v0  ;;  %v155_v2 = vld [vmem:[#allocation5 + $0x68] sm:$0xff]  ;;  %v154_v3 = vld [vmem:[#allocation5 + $0x60] sm:$0xff]  ;;  %v140_v4 = vld [vmem:[#allocation2] sm:$0xff]  ;;  %s747_s15 = sshll.u32 %s1275_s29, 4  ;;  %s748_s15 = int_to_ptr.vmem [resolvable:$true] %s747_s15 }
  0x55   :  { %877 = vmatpush3.msra.mxu0 %v157_v0  ;;  %v153_v5 = vld [vmem:[#allocation5 + $0x58] sm:$0xff]  ;;  %908 = vmatprep.mubr.f32.mxu0 %v140_v4  ;;  %v256_v7 = vld [vmem:[#allocation7 + $0x70] sm:$0xff]  ;;  %v255_v9 = vld [vmem:[#allocation7 + $0x68] sm:$0xff]  ;;  %p1241_p8 = scmp.lt.s32.totalorder %s748_s15, %s748_s15 }
  0x56   :  { %878 = vmatprep.subr.mxu0 %v156_v1  ;;  %v257_v6 = vld [vmem:[#allocation7 + $0x78] sm:$0xff]  ;;  %v152_v8 = vld [vmem:[#allocation5 + $0x50] sm:$0xff]  ;;  %v151_v10 = vld [vmem:[#allocation5 + $0x48] sm:$0xff] }
  0x57   :  { %879 = vmatpush3.msra.mxu0 %v156_v1  ;;  %911 = vmatprep.subr.mxu1 %v257_v6  ;;  %v254_v11 = vld [vmem:[#allocation7 + $0x60] sm:$0xff]  ;;  %v253_v13 = vld [vmem:[#allocation7 + $0x58] sm:$0xff]  ;;  %v252_v15 = vld [vmem:[#allocation7 + $0x50] sm:$0xff] }
  0x58   :  { %880 = vmatprep.subr.mxu0 %v155_v2  ;;  %912 = vmatpush3.msra.mxu1 %v257_v6  ;;  %v150_v12 = vld [vmem:[#allocation5 + $0x40] sm:$0xff]  ;;  %v149_v14 = vld [vmem:[#allocation5 + $0x38] sm:$0xff]  ;;  %v148_v16 = vld [vmem:[#allocation5 + $0x30] sm:$0xff] }
  0x59   :  { %881 = vmatpush3.msra.mxu0 %v155_v2  ;;  %913 = vmatprep.subr.mxu1 %v256_v7  ;;  %v251_v17 = vld [vmem:[#allocation7 + $0x48] sm:$0xff]  ;;  %v250_v19 = vld [vmem:[#allocation7 + $0x40] sm:$0xff]  ;;  %v249_v21 = vld [vmem:[#allocation7 + $0x38] sm:$0xff] }
  0x5a   :  { %882 = vmatprep.subr.mxu0 %v154_v3  ;;  %914 = vmatpush3.msra.mxu1 %v256_v7  ;;  %v147_v18 = vld [vmem:[#allocation5 + $0x28] sm:$0xff]  ;;  %v146_v20 = vld [vmem:[#allocation5 + $0x20] sm:$0xff]  ;;  %v145_v22 = vld [vmem:[#allocation5 + $0x18] sm:$0xff] }
  0x5b   :  { %883 = vmatpush3.msra.mxu0 %v154_v3  ;;  %915 = vmatprep.subr.mxu1 %v255_v9  ;;  %v248_v23 = vld [vmem:[#allocation7 + $0x30] sm:$0xff]  ;;  %v247_v25 = vld [vmem:[#allocation7 + $0x28] sm:$0xff]  ;;  %v246_v27 = vld [vmem:[#allocation7 + $0x20] sm:$0xff] }
  0x5c   :  { %884 = vmatprep.subr.mxu0 %v153_v5  ;;  %916 = vmatpush3.msra.mxu1 %v255_v9  ;;  %v144_v24 = vld [vmem:[#allocation5 + $0x10] sm:$0xff]  ;;  %v143_v26 = vld [vmem:[#allocation5 + $0x8] sm:$0xff]  ;;  %v142_v28 = vld [vmem:[#allocation5] sm:$0xff] }
  0x5d   :  { %885 = vmatpush3.msra.mxu0 %v153_v5  ;;  %917 = vmatprep.subr.mxu1 %v254_v11  ;;  %v141_v29 = vld [vmem:[#allocation2 + $0x8] sm:$0xff]  ;;  %v244_v31 = vld [vmem:[#allocation7 + $0x10] sm:$0xff]  ;;  %v243_v32 = vld [vmem:[#allocation7 + $0x8] sm:$0xff] }
  0x5e   :  { %886 = vmatprep.subr.mxu0 %v152_v8  ;;  %918 = vmatpush3.msra.mxu1 %v254_v11  ;;  %v245_v30 = vld [vmem:[#allocation7 + $0x18] sm:$0xff]  ;;  %v242_v33 = vld [vmem:[#allocation7] sm:$0xff]  ;;  %v356_v35 = vld [vmem:[#allocation8 + $0x70] sm:$0xff] }
  0x5f   :  { %887 = vmatpush3.msra.mxu0 %v152_v8  ;;  %919 = vmatprep.subr.mxu1 %v253_v13  ;;  %v357_v34 = vld [vmem:[#allocation8 + $0x78] sm:$0xff]  ;;  %v355_v36 = vld [vmem:[#allocation8 + $0x68] sm:$0xff]  ;;  %v354_v37 = vld [vmem:[#allocation8 + $0x60] sm:$0xff] }
  0x60   :  { %888 = vmatprep.subr.mxu0 %v151_v10  ;;  %920 = vmatpush3.msra.mxu1 %v253_v13  ;;  %v353_v38 = vld [vmem:[#allocation8 + $0x58] sm:$0xff]  ;;  %v352_v39 = vld [vmem:[#allocation8 + $0x50] sm:$0xff]  ;;  %v351_v40 = vld [vmem:[#allocation8 + $0x48] sm:$0xff] }
  0x61   :  { %889 = vmatpush3.msra.mxu0 %v151_v10  ;;  %921 = vmatprep.subr.mxu1 %v252_v15  ;;  %v350_v41 = vld [vmem:[#allocation8 + $0x40] sm:$0xff]  ;;  %v349_v42 = vld [vmem:[#allocation8 + $0x38] sm:$0xff]  ;;  %v348_v43 = vld [vmem:[#allocation8 + $0x30] sm:$0xff] }
  0x62   :  { %890 = vmatprep.subr.mxu0 %v150_v12  ;;  %922 = vmatpush3.msra.mxu1 %v252_v15  ;;  %v347_v44 = vld [vmem:[#allocation8 + $0x28] sm:$0xff]  ;;  %v346_v45 = vld [vmem:[#allocation8 + $0x20] sm:$0xff]  ;;  %v762_v46 = vld [vmem:[%s1414_s2] ss:$0 sm:$0xff] }
  0x63   :  { %891 = vmatpush3.msra.mxu0 %v150_v12  ;;  %923 = vmatprep.subr.mxu1 %v251_v17  ;;  %v345_v53 = vld [vmem:[#allocation8 + $0x18] sm:$0xff]  ;;  %v344_v54 = vld [vmem:[#allocation8 + $0x10] sm:$0xff]  ;;  %v343_v55 = vld [vmem:[#allocation8 + $0x8] sm:$0xff] }
  0x64   :  { %892 = vmatprep.subr.mxu0 %v149_v14  ;;  %924 = vmatpush3.msra.mxu1 %v251_v17  ;;  %v342_v56 = vld [vmem:[#allocation8] sm:$0xff]  ;;  %v457_v57 = vld [vmem:[#allocation10 + $0x78] sm:$0xff]  ;;  %v456_v58 = vld [vmem:[#allocation10 + $0x70] sm:$0xff] }
  0x65   :  { %893 = vmatpush3.msra.mxu0 %v149_v14  ;;  %925 = vmatprep.subr.mxu1 %v250_v19  ;;  %v455_v59 = vld [vmem:[#allocation10 + $0x68] sm:$0xff]  ;;  %v454_v60 = vld [vmem:[#allocation10 + $0x60] sm:$0xff]  ;;  %v453_v61 = vld [vmem:[#allocation10 + $0x58] sm:$0xff] }
  0x66   :  { %894 = vmatprep.subr.mxu0 %v148_v16  ;;  %926 = vmatpush3.msra.mxu1 %v250_v19  ;;  %v452_v62 = vld [vmem:[#allocation10 + $0x50] sm:$0xff]  ;;  %v451_v63 = vld [vmem:[#allocation10 + $0x48] sm:$0xff]  ;;  %v450_v0 = vld [vmem:[#allocation10 + $0x40] sm:$0xff] }
  0x67   :  { %895 = vmatpush3.msra.mxu0 %v148_v16  ;;  %927 = vmatprep.subr.mxu1 %v249_v21  ;;  %v449_v1 = vld [vmem:[#allocation10 + $0x38] sm:$0xff]  ;;  %v448_v2 = vld [vmem:[#allocation10 + $0x30] sm:$0xff]  ;;  %v447_v3 = vld [vmem:[#allocation10 + $0x28] sm:$0xff] }
  0x68   :  { %896 = vmatprep.subr.mxu0 %v147_v18  ;;  %928 = vmatpush3.msra.mxu1 %v249_v21  ;;  %v446_v4 = vld [vmem:[#allocation10 + $0x20] sm:$0xff]  ;;  %v763_v5 = vld [vmem:[%s1416_s4] ss:$0 sm:$0xff]  ;;  %v445_v12 = vld [vmem:[#allocation10 + $0x18] sm:$0xff] }
  0x69   :  { %897 = vmatpush3.msra.mxu0 %v147_v18  ;;  %929 = vmatprep.subr.mxu1 %v248_v23  ;;  %v444_v13 = vld [vmem:[#allocation10 + $0x10] sm:$0xff]  ;;  %v443_v14 = vld [vmem:[#allocation10 + $0x8] sm:$0xff]  ;;  %v442_v15 = vld [vmem:[#allocation10] sm:$0xff] }
  0x6a   :  { %898 = vmatprep.subr.mxu0 %v146_v20  ;;  %930 = vmatpush3.msra.mxu1 %v248_v23  ;;  %v557_v16 = vld [vmem:[#allocation11 + $0x78] sm:$0xff]  ;;  %v556_v17 = vld [vmem:[#allocation11 + $0x70] sm:$0xff]  ;;  %v555_v18 = vld [vmem:[#allocation11 + $0x68] sm:$0xff] }
  0x6b   :  { %899 = vmatpush3.msra.mxu0 %v146_v20  ;;  %931 = vmatprep.subr.mxu1 %v247_v25  ;;  %v554_v19 = vld [vmem:[#allocation11 + $0x60] sm:$0xff]  ;;  %v553_v20 = vld [vmem:[#allocation11 + $0x58] sm:$0xff]  ;;  %v552_v21 = vld [vmem:[#allocation11 + $0x50] sm:$0xff] }
  0x6c   :  { %900 = vmatprep.subr.mxu0 %v145_v22  ;;  %932 = vmatpush3.msra.mxu1 %v247_v25  ;;  %v550_v23 = vld [vmem:[#allocation11 + $0x40] sm:$0xff]  ;;  %v548_v25 = vld [vmem:[#allocation11 + $0x30] sm:$0xff] }
  0x6d   :  { %901 = vmatpush3.msra.mxu0 %v145_v22  ;;  %933 = vmatprep.subr.mxu1 %v246_v27  ;;  %v551_v22 = vld [vmem:[#allocation11 + $0x48] sm:$0xff] }
  0x6e   :  { %902 = vmatprep.subr.mxu0 %v144_v24  ;;  %934 = vmatpush3.msra.mxu1 %v246_v27  ;;  %v546_v27 = vld [vmem:[#allocation11 + $0x20] sm:$0xff] }
  0x6f   :  { %903 = vmatpush3.msra.mxu0 %v144_v24  ;;  %935 = vmatprep.subr.mxu1 %v245_v30  ;;  %v549_v24 = vld [vmem:[#allocation11 + $0x38] sm:$0xff] }
  0x70   :  { %904 = vmatprep.subr.mxu0 %v143_v26  ;;  %936 = vmatpush3.msra.mxu1 %v245_v30 }
  0x71   :  { %905 = vmatpush3.msra.mxu0 %v143_v26  ;;  %937 = vmatprep.subr.mxu1 %v244_v31  ;;  %v547_v26 = vld [vmem:[#allocation11 + $0x28] sm:$0xff] }
  0x72   :  { %906 = vmatprep.subr.mxu0 %v142_v28  ;;  %938 = vmatpush3.msra.mxu1 %v244_v31 }
  0x73   :  { %907 = vmatpush3.msra.mxu0 %v142_v28  ;;  %939 = vmatprep.subr.mxu1 %v243_v32  ;;  %v764_v28 = vld [vmem:[%s1418_s6] ss:$0 sm:$0xff] }
  0x74   :  { %909 = vmatmul.mubr.f32.vlgmr.msra.gmra.mxu0 %v141_v29  ;;  %940 = vmatpush3.msra.mxu1 %v243_v32 }
  0x75   :  { %941 = vmatprep.subr.mxu1 %v242_v33  ;;  %946 = vmatprep.subr.mxu0 %v357_v34 }
  0x76   :  { %942 = vmatpush3.msra.mxu1 %v242_v33  ;;  %947 = vmatpush3.msra.mxu0 %v357_v34 }
  0x77   :  { %948 = vmatprep.subr.mxu0 %v356_v35  ;;  %981 = vmatprep.subr.mxu1 %v457_v57 }
  0x78   :  { %949 = vmatpush3.msra.mxu0 %v356_v35  ;;  %v545_v35 = vld [vmem:[#allocation11 + $0x18] sm:$0xff] }
  0x79   :  { %950 = vmatprep.subr.mxu0 %v355_v36 }
  0x7a   :  { %951 = vmatpush3.msra.mxu0 %v355_v36  ;;  %v544_v36 = vld [vmem:[#allocation11 + $0x10] sm:$0xff] }
  0x7b   :  { %952 = vmatprep.subr.mxu0 %v354_v37 }
  0x7c   :  { %953 = vmatpush3.msra.mxu0 %v354_v37  ;;  %v543_v37 = vld [vmem:[#allocation11 + $0x8] sm:$0xff] }
  0x7d   :  { %954 = vmatprep.subr.mxu0 %v353_v38 }
  0x7e   :  { %955 = vmatpush3.msra.mxu0 %v353_v38  ;;  %v542_v38 = vld [vmem:[#allocation11] sm:$0xff] }
  0x7f   :  { %956 = vmatprep.subr.mxu0 %v352_v39 }
  0x80   :  { %957 = vmatpush3.msra.mxu0 %v352_v39  ;;  %v657_v39 = vld [vmem:[#allocation13 + $0x78] sm:$0xff] }
  0x81   :  { %958 = vmatprep.subr.mxu0 %v351_v40 }
  0x82   :  { %959 = vmatpush3.msra.mxu0 %v351_v40  ;;  %v656_v40 = vld [vmem:[#allocation13 + $0x70] sm:$0xff] }
  0x83   :  { %960 = vmatprep.subr.mxu0 %v350_v41 }
  0x84   :  { %961 = vmatpush3.msra.mxu0 %v350_v41  ;;  %v655_v41 = vld [vmem:[#allocation13 + $0x68] sm:$0xff] }
  0x85   :  { %962 = vmatprep.subr.mxu0 %v349_v42 }
  0x86   :  { %963 = vmatpush3.msra.mxu0 %v349_v42  ;;  %v654_v42 = vld [vmem:[#allocation13 + $0x60] sm:$0xff] }
  0x87   :  { %964 = vmatprep.subr.mxu0 %v348_v43 }
  0x88   :  { %965 = vmatpush3.msra.mxu0 %v348_v43  ;;  %v653_v43 = vld [vmem:[#allocation13 + $0x58] sm:$0xff] }
  0x89   :  { %966 = vmatprep.subr.mxu0 %v347_v44 }
  0x8a   :  { %967 = vmatpush3.msra.mxu0 %v347_v44  ;;  %v652_v44 = vld [vmem:[#allocation13 + $0x50] sm:$0xff] }
  0x8b   :  { %968 = vmatprep.subr.mxu0 %v346_v45 }
  0x8c   :  { %969 = vmatpush3.msra.mxu0 %v346_v45  ;;  %v651_v45 = vld [vmem:[#allocation13 + $0x48] sm:$0xff] }
  0x8d   :  { %970 = vmatprep.subr.mxu0 %v345_v53 }
  0x8e   :  { %971 = vmatpush3.msra.mxu0 %v345_v53 }
  0x8f   :  { %972 = vmatprep.subr.mxu0 %v344_v54 }
  0x90   :  { %973 = vmatpush3.msra.mxu0 %v344_v54 }
  0x91   :  { %974 = vmatprep.subr.mxu0 %v343_v55 }
  0x92   :  { %975 = vmatpush3.msra.mxu0 %v343_v55 }
  0x93   :  { %976 = vmatprep.subr.mxu0 %v342_v56 }
  0x94   :  { %977 = vmatpush3.msra.mxu0 %v342_v56 }
  0x95   :  { %1016 = vmatprep.subr.mxu0 %v557_v16 }
 0x134   :  { %v910_v47 = vpop.f32.mrf.mxu0 }
 0x135   :  { %v237_v48 = vadd.f32 %v910_v47, %v762_v46  ;;  %v649_v47 = vld [vmem:[#allocation13 + $0x38] sm:$0xff] }
 0x136   :  { %v231_v49 = vpop.f32.mrf.mxu0 }
 0x137   :  { %v232_v50 = vadd.f32 %v762_v46, %v231_v49  ;;  %v241_v52 = vmax.f32 %v237_v48, 0.0  ;;  %v650_v46 = vld [vmem:[#allocation13 + $0x40] sm:$0xff]  ;;  %v648_v48 = vld [vmem:[#allocation13 + $0x30] sm:$0xff]  ;;  %v647_v49 = vld [vmem:[#allocation13 + $0x28] sm:$0xff] }
 0x139   :  { %v240_v51 = vmax.f32 %v232_v50, 0.0  ;;  %v646_v50 = vld [vmem:[#allocation13 + $0x20] sm:$0xff] }
 0x13b   :  { %943 = vmatprep.mubr.f32.mxu1 %v240_v51  ;;  %v765_v51 = vld [vmem:[%s1420_s8] ss:$0 sm:$0xff] }
 0x13c   :  { %944 = vmatmul.mubr.f32.vlgmr.msra.gmra.mxu1 %v241_v52 }
 0x13d   :  { %982 = vmatpush3.msra.mxu1 %v457_v57 }
 0x13e   :  { %983 = vmatprep.subr.mxu1 %v456_v58 }
 0x13f   :  { %984 = vmatpush3.msra.mxu1 %v456_v58  ;;  %v645_v58 = vld [vmem:[#allocation13 + $0x18] sm:$0xff] }
 0x140   :  { %985 = vmatprep.subr.mxu1 %v455_v59 }
 0x141   :  { %986 = vmatpush3.msra.mxu1 %v455_v59  ;;  %v644_v59 = vld [vmem:[#allocation13 + $0x10] sm:$0xff] }
 0x142   :  { %987 = vmatprep.subr.mxu1 %v454_v60 }
 0x143   :  { %988 = vmatpush3.msra.mxu1 %v454_v60  ;;  %v643_v60 = vld [vmem:[#allocation13 + $0x8] sm:$0xff] }
 0x144   :  { %989 = vmatprep.subr.mxu1 %v453_v61 }
 0x145   :  { %990 = vmatpush3.msra.mxu1 %v453_v61  ;;  %v642_v61 = vld [vmem:[#allocation13] sm:$0xff] }
 0x146   :  { %991 = vmatprep.subr.mxu1 %v452_v62 }
 0x147   :  { %992 = vmatpush3.msra.mxu1 %v452_v62  ;;  %v766_v62 = vld [vmem:[%s1422_s10] ss:$0 sm:$0xff]  ;;  %s1236_s10 = scalar_lea.vmem %s748_s15, 256 }
 0x148   :  { %993 = vmatprep.subr.mxu1 %v451_v63  ;;  %p1237_p7 = scmp.ne.s32.totalorder %s748_s15, %s1236_s10  ;;  %p1242_p9 = scmp.lt.s32.totalorder %s1236_s10, %s1236_s10 }
 0x149   :  { %994 = vmatpush3.msra.mxu1 %v451_v63 }
 0x14a   :  { %995 = vmatprep.subr.mxu1 %v450_v0  ;;  %p1243_p10 = por %p1242_p9, %p1241_p8 }
 0x14b   :  { %996 = vmatpush3.msra.mxu1 %v450_v0 }
 0x14c   :  { %997 = vmatprep.subr.mxu1 %v449_v1  ;;  %p1244_p11 = pnand %p1243_p10, %p1237_p7 }
 0x14d   :  { %998 = vmatpush3.msra.mxu1 %v449_v1 }
 0x14e   :  { %999 = vmatprep.subr.mxu1 %v448_v2 }
 0x14f   :  { %1000 = vmatpush3.msra.mxu1 %v448_v2 }
 0x150   :  { %1001 = vmatprep.subr.mxu1 %v447_v3 }
 0x151   :  { %1002 = vmatpush3.msra.mxu1 %v447_v3 }
 0x152   :  { %1003 = vmatprep.subr.mxu1 %v446_v4 }
 0x153   :  { %1004 = vmatpush3.msra.mxu1 %v446_v4 }
 0x154   :  { %1005 = vmatprep.subr.mxu1 %v445_v12 }
 0x155   :  { %1006 = vmatpush3.msra.mxu1 %v445_v12 }
 0x156   :  { %1007 = vmatprep.subr.mxu1 %v444_v13 }
 0x157   :  { %1008 = vmatpush3.msra.mxu1 %v444_v13 }
 0x158   :  { %1009 = vmatprep.subr.mxu1 %v443_v14 }
 0x159   :  { %1010 = vmatpush3.msra.mxu1 %v443_v14 }
 0x15a   :  { %1011 = vmatprep.subr.mxu1 %v442_v15 }
 0x15b   :  { %1012 = vmatpush3.msra.mxu1 %v442_v15 }
 0x15c   :  { %1051 = vmatprep.subr.mxu1 %v657_v39 }
 0x1fc   :  { %v945_v6 = vpop.f32.mrf.mxu1 }
 0x1fd   :  { %v337_v7 = vadd.f32 %v945_v6, %v763_v5 }
 0x1fe   :  { %v331_v8 = vpop.f32.mrf.mxu1 }
 0x1ff   :  { %v332_v9 = vadd.f32 %v763_v5, %v331_v8  ;;  %v341_v11 = vmax.f32 %v337_v7, 0.0  ;;  %v767_v5 = vld [vmem:[%s1424_s12] ss:$0 sm:$0xff] }
 0x201   :  { %v340_v10 = vmax.f32 %v332_v9, 0.0 }
 0x203   :  { %978 = vmatprep.mubr.f32.mxu0 %v340_v10 }
 0x204   :  { %979 = vmatmul.mubr.f32.vlgmr.msra.gmra.mxu0 %v341_v11 }
 0x205   :  { %1017 = vmatpush3.msra.mxu0 %v557_v16 }
 0x206   :  { %1018 = vmatprep.subr.mxu0 %v556_v17 }
 0x207   :  { %1019 = vmatpush3.msra.mxu0 %v556_v17 }
 0x208   :  { %1020 = vmatprep.subr.mxu0 %v555_v18 }
 0x209   :  { %1021 = vmatpush3.msra.mxu0 %v555_v18 }
 0x20a   :  { %1022 = vmatprep.subr.mxu0 %v554_v19 }
 0x20b   :  { %1023 = vmatpush3.msra.mxu0 %v554_v19 }
 0x20c   :  { %1024 = vmatprep.subr.mxu0 %v553_v20 }
 0x20d   :  { %1025 = vmatpush3.msra.mxu0 %v553_v20 }
 0x20e   :  { %1026 = vmatprep.subr.mxu0 %v552_v21 }
 0x20f   :  { %1027 = vmatpush3.msra.mxu0 %v552_v21 }
 0x210   :  { %1028 = vmatprep.subr.mxu0 %v551_v22 }
 0x211   :  { %1029 = vmatpush3.msra.mxu0 %v551_v22 }
 0x212   :  { %1030 = vmatprep.subr.mxu0 %v550_v23 }
 0x213   :  { %1031 = vmatpush3.msra.mxu0 %v550_v23 }
 0x214   :  { %1032 = vmatprep.subr.mxu0 %v549_v24 }
 0x215   :  { %1033 = vmatpush3.msra.mxu0 %v549_v24 }
 0x216   :  { %1034 = vmatprep.subr.mxu0 %v548_v25 }
 0x217   :  { %1035 = vmatpush3.msra.mxu0 %v548_v25 }
 0x218   :  { %1036 = vmatprep.subr.mxu0 %v547_v26 }
 0x219   :  { %1037 = vmatpush3.msra.mxu0 %v547_v26 }
 0x21a   :  { %1038 = vmatprep.subr.mxu0 %v546_v27 }
 0x21b   :  { %1039 = vmatpush3.msra.mxu0 %v546_v27 }
 0x21c   :  { %1040 = vmatprep.subr.mxu0 %v545_v35 }
 0x21d   :  { %1041 = vmatpush3.msra.mxu0 %v545_v35 }
 0x21e   :  { %1042 = vmatprep.subr.mxu0 %v544_v36 }
 0x21f   :  { %1043 = vmatpush3.msra.mxu0 %v544_v36 }
 0x220   :  { %1044 = vmatprep.subr.mxu0 %v543_v37 }
 0x221   :  { %1045 = vmatpush3.msra.mxu0 %v543_v37 }
 0x222   :  { %1046 = vmatprep.subr.mxu0 %v542_v38 }
 0x223   :  { %1047 = vmatpush3.msra.mxu0 %v542_v38 }
 0x2c4   :  { %v980_v29 = vpop.f32.mrf.mxu0 }
 0x2c5   :  { %v437_v30 = vadd.f32 %v980_v29, %v764_v28 }
 0x2c6   :  { %v431_v31 = vpop.f32.mrf.mxu0 }
 0x2c7   :  { %v432_v32 = vadd.f32 %v764_v28, %v431_v31  ;;  %v441_v34 = vmax.f32 %v437_v30, 0.0 }
 0x2c9   :  { %v440_v33 = vmax.f32 %v432_v32, 0.0 }
 0x2cb   :  { %1013 = vmatprep.mubr.f32.mxu1 %v440_v33 }
 0x2cc   :  { %1014 = vmatmul.mubr.f32.vlgmr.msra.gmra.mxu1 %v441_v34 }
 0x2cd   :  { %1052 = vmatpush3.msra.mxu1 %v657_v39 }
 0x2ce   :  { %1053 = vmatprep.subr.mxu1 %v656_v40 }
 0x2cf   :  { %1054 = vmatpush3.msra.mxu1 %v656_v40 }
 0x2d0   :  { %1055 = vmatprep.subr.mxu1 %v655_v41 }
 0x2d1   :  { %1056 = vmatpush3.msra.mxu1 %v655_v41 }
 0x2d2   :  { %1057 = vmatprep.subr.mxu1 %v654_v42 }
 0x2d3   :  { %1058 = vmatpush3.msra.mxu1 %v654_v42 }
 0x2d4   :  { %1059 = vmatprep.subr.mxu1 %v653_v43 }
 0x2d5   :  { %1060 = vmatpush3.msra.mxu1 %v653_v43 }
 0x2d6   :  { %1061 = vmatprep.subr.mxu1 %v652_v44 }
 0x2d7   :  { %1062 = vmatpush3.msra.mxu1 %v652_v44 }
 0x2d8   :  { %1063 = vmatprep.subr.mxu1 %v651_v45 }
 0x2d9   :  { %1064 = vmatpush3.msra.mxu1 %v651_v45 }
 0x2da   :  { %1065 = vmatprep.subr.mxu1 %v650_v46 }
 0x2db   :  { %1066 = vmatpush3.msra.mxu1 %v650_v46 }
 0x2dc   :  { %1067 = vmatprep.subr.mxu1 %v649_v47 }
 0x2dd   :  { %1068 = vmatpush3.msra.mxu1 %v649_v47 }
 0x2de   :  { %1069 = vmatprep.subr.mxu1 %v648_v48 }
 0x2df   :  { %1070 = vmatpush3.msra.mxu1 %v648_v48 }
 0x2e0   :  { %1071 = vmatprep.subr.mxu1 %v647_v49 }
 0x2e1   :  { %1072 = vmatpush3.msra.mxu1 %v647_v49 }
 0x2e2   :  { %1073 = vmatprep.subr.mxu1 %v646_v50 }
 0x2e3   :  { %1074 = vmatpush3.msra.mxu1 %v646_v50 }
 0x2e4   :  { %1075 = vmatprep.subr.mxu1 %v645_v58 }
 0x2e5   :  { %1076 = vmatpush3.msra.mxu1 %v645_v58 }
 0x2e6   :  { %1077 = vmatprep.subr.mxu1 %v644_v59 }
 0x2e7   :  { %1078 = vmatpush3.msra.mxu1 %v644_v59 }
 0x2e8   :  { %1079 = vmatprep.subr.mxu1 %v643_v60 }
 0x2e9   :  { %1080 = vmatpush3.msra.mxu1 %v643_v60 }
 0x2ea   :  { %1081 = vmatprep.subr.mxu1 %v642_v61 }
 0x2eb   :  { %1082 = vmatpush3.msra.mxu1 %v642_v61 }
 0x38c   :  { %v1015_v52 = vpop.f32.mrf.mxu1 }
 0x38d   :  { %v537_v53 = vadd.f32 %v1015_v52, %v765_v51 }
 0x38e   :  { %v531_v54 = vpop.f32.mrf.mxu1 }
 0x38f   :  { %v532_v55 = vadd.f32 %v765_v51, %v531_v54  ;;  %v541_v57 = vmax.f32 %v537_v53, 0.0 }
 0x391   :  { %v540_v56 = vmax.f32 %v532_v55, 0.0 }
 0x393   :  { %1048 = vmatprep.mubr.f32.mxu0 %v540_v56 }
 0x394   :  { %1049 = vmatmul.mubr.f32.vlgmr.msra.gmra.mxu0 %v541_v57 }
 0x454   :  { %v1050_v63 = vpop.f32.mrf.mxu0 }
 0x455   :  { %v637_v0 = vadd.f32 %v1050_v63, %v766_v62 }
 0x456   :  { %v631_v1 = vpop.f32.mrf.mxu0 }
 0x457   :  { %v632_v2 = vadd.f32 %v766_v62, %v631_v1  ;;  %v641_v4 = vmax.f32 %v637_v0, 0.0 }
 0x459   :  { %v640_v3 = vmax.f32 %v632_v2, 0.0 }
 0x45b   :  { %1083 = vmatprep.mubr.f32.mxu1 %v640_v3 }
 0x45c   :  { %1084 = vmatmul.mubr.f32.vlgmr.msra.gmra.mxu1 %v641_v4 }
 0x51c   :  { %v1085_v6 = vpop.f32.mrf.mxu1 }
 0x51d   :  { %v737_v7 = vadd.f32 %v1085_v6, %v767_v5 }
 0x51e   :  { %v731_v8 = vpop.f32.mrf.mxu1 }
 0x51f   :  { %741 = vst [vmem:[#allocation14 + $0x8] sm:$0xff] %v737_v7  ;;  %v732_v9 = vadd.f32 %v767_v5, %v731_v8 }
 0x521   :  { %740 = vst [vmem:[#allocation14] sm:$0xff] %v732_v9 }
 0x522   :  { %1247 = shalt.err (!%p1244_p11)
}
 0x523   :  { %753 = dma.vmem_to_hbm [thread:$0]  %s748_s15, 256, %s1425_s13, [#allocation4], %s1268_s30, %s1268_s30, %s1269_s14  }
 0x524   :  { %1264 = dma.done.wait [#allocation4], 256  }
 0x525   :  { %1265 = vsyncadd [#allocation4], 4294967040 }
 0x526   :  { %757 = vsyncpa [#allocation3], 1 }
 0x527   :  { %758 = vsyncpa [#allocation6], 1 }
 0x528   :  { %759 = vsyncpa [#allocation9], 1 }
 0x529   :  { %760 = vsyncpa [#allocation12], 1 }
 0x52a   :  { %761 = vsyncpa [#allocation4], 1 }

</bundles_post_ra>
